<compile_context>
chip_gen: v5e
topology: v5e:2x2
jax: 0.10.0
libtpu: 0.0.40
codegen_flags: <defaults>
</compile_context>

<pallas_src>
from functools import lru_cache

import numpy as np
import jax
import jax.numpy as jnp
from jax import lax
from jax.experimental import pallas as pl
from jax.experimental.pallas import tpu as pltpu


# --------------------------------------------------------------------------- #
# Host-side helpers
# --------------------------------------------------------------------------- #
@lru_cache(maxsize=None)
def _dft_mats(n, n_pad):
    """Unitary ('ortho') DFT matrix of size n, zero-padded to (n_pad, n_pad)."""
    idx = np.arange(n)
    ang = -2.0 * np.pi * np.outer(idx, idx) / n
    scale = 1.0 / np.sqrt(n)
    fr = np.zeros((n_pad, n_pad), np.float32)
    fi = np.zeros((n_pad, n_pad), np.float32)
    fr[:n, :n] = np.cos(ang) * scale
    fi[:n, :n] = np.sin(ang) * scale
    return jnp.asarray(fr), jnp.asarray(fi)


def _vmem_capacity_bytes():
    """Physical per-core VMEM (128 MiB v5e/v6e, 64 MiB v7x), with fallback."""
    try:
        info = pltpu.get_tpu_info()
        for attr in ("vmem_capacity_bytes", "vmem_size_bytes", "vmem_bytes"):
            v = getattr(info, attr, None)
            if v:
                return int(v)
    except Exception:
        pass
    return 64 * 1024 * 1024


def _plan(B, C, N, cap):
    """Pick csm residency, coil-chunk size and vmem limit for this chip."""
    f32 = 4
    budget = int(cap * 0.75)
    vmem_limit = max(32 * 1024 * 1024,
                     min(int(cap * 0.85), cap - 2 * 1024 * 1024))
    # persistent: rhs(2) + CG carries x/r/p/Ap(8) + outputs(2) + mask(1) + F mats
    fixed = (13 * B * N * N + 8 * N * N) * f32
    # live per-coil intermediates in one AtA chunk (csm r/i, coil images,
    # k-space, adjoint images, matmul temporaries, transpose copies)
    per_cc = 16 * B * N * N * f32
    csm_bytes = 2 * B * C * N * N * f32

    if csm_bytes + fixed + per_cc <= budget:          # csm fully VMEM-resident
        cc = max(d for d in range(1, C + 1)
                 if C % d == 0 and csm_bytes + fixed + per_cc * d <= budget)
        return True, cc, vmem_limit

    # streaming: packed double-buffer (2 slots x (re,im) chunk) + intermediates
    cc = 1
    for d in range(1, C + 1):
        if C % d == 0 and fixed + (4 * B * N * N * f32 + per_cc) * d <= budget:
            cc = d
    return False, cc, vmem_limit


# --------------------------------------------------------------------------- #
# Kernel
# --------------------------------------------------------------------------- #
def _make_dc_kernel(resident, nch, B, cc, N):
    MC = B * cc

    def _shared(lam_ref, rhsr_ref, rhsi_ref, m2t_ref, fr_ref, fi_ref,
                outr_ref, outi_ref, chunk_loop):
        lam = lam_ref[0]
        fr = fr_ref[...]                       # (N, N) unitary DFT, real part
        fi = fi_ref[...]                       # (N, N) unitary DFT, imag part
        fin = -fi                              # conj(F) imag part
        fsf = fr + fi                          # hoisted Karatsuba operand (fwd)
        fsb = fr - fi                          # hoisted Karatsuba operand (adj)
        m2t = m2t_ref[...]                     # (B, N, N) mask^2, transposed

        def karatsuba(xr, xi, wr, wi, ws):
            # (xr + i*xi) @ (wr + i*wi) with 3 MXU matmuls (Karatsuba),
            # batch collapsed into (MC*N, N) rows, stationary (N, N) RHS.
            a2 = xr.reshape(MC * N, N)
            b2 = xi.reshape(MC * N, N)
            p1 = jnp.dot(a2, wr, preferred_element_type=jnp.float32)
            p2 = jnp.dot(b2, wi, preferred_element_type=jnp.float32)
            p3 = jnp.dot(a2 + b2, ws, preferred_element_type=jnp.float32)
            return ((p1 - p2).reshape(MC, N, N),
                    (p3 - p1 - p2).reshape(MC, N, N))

        def fft2_t(xr, xi, wr, wi, ws):
            # W symmetric => applying [right-mult, transpose, right-mult]
            # yields (W X W)^T; applied twice returns natural orientation.
            tr, ti = karatsuba(xr, xi, wr, wi, ws)
            tr = jnp.swapaxes(tr, -1, -2)
            ti = jnp.swapaxes(ti, -1, -2)
            return karatsuba(tr, ti, wr, wi, ws)

        def chunk_update(acc, chunk, pr, pi):
            # chunk: (2, B*cc, N, N) -> csm real/imag for this coil chunk.
            acc_r, acc_i = acc
            cr = chunk[0].reshape(B, cc, N, N)
            ci = chunk[1].reshape(B, cc, N, N)
            # coil images: csm * p
            sr = (cr * pr[:, None] - ci * pi[:, None]).reshape(MC, N, N)
            si = (cr * pi[:, None] + ci * pr[:, None]).reshape(MC, N, N)
            # forward model: orthonormal 2-D DFT (k-space held transposed)
            kr, ki = fft2_t(sr, si, fr, fi, fsf)
            # fused fwd+adj masking (mask^2), broadcast over coils
            kr = (kr.reshape(B, cc, N, N) * m2t[:, None]).reshape(MC, N, N)
            ki = (ki.reshape(B, cc, N, N) * m2t[:, None]).reshape(MC, N, N)
            # adjoint: inverse DFT with conj(F); natural orientation
            zr, zi = fft2_t(kr, ki, fr, fin, fsb)
            zr = zr.reshape(B, cc, N, N)
            zi = zi.reshape(B, cc, N, N)
            # coil combine with conj(csm)
            return (acc_r + jnp.sum(cr * zr + ci * zi, axis=1),
                    acc_i + jnp.sum(cr * zi - ci * zr, axis=1))

        def ata(pr, pi):
            return chunk_loop(chunk_update, pr, pi, (lam * pr, lam * pi))

        rhs_r = rhsr_ref[...]
        rhs_i = rhsi_ref[...]
        rtr0 = jnp.sum(rhs_r * rhs_r + rhs_i * rhs_i)

        # myCG: while i < 10 and rTr > 1e-10 -> 10 fixed iterations with
        # scalar-only gating of alpha/beta (equivalent final x).
        def cg_body(_, carry):
            xr, xi, rr, ri, pr, pi, rtr = carry
            apr, api = ata(pr, pi)
            active = rtr > 1e-10
            pap = jnp.sum(pr * apr + pi * api)          # Re(sum(conj(p)*Ap))
            alpha = jnp.where(active, rtr / jnp.where(active, pap, 1.0), 0.0)
            xr = xr + alpha * pr
            xi = xi + alpha * pi
            rr = rr - alpha * apr
            ri = ri - alpha * api
            rtr_new = jnp.sum(rr * rr + ri * ri)
            beta = jnp.where(active, rtr_new / jnp.where(active, rtr, 1.0), 0.0)
            pr = rr + beta * pr
            pi = ri + beta * pi
            rtr = jnp.where(active, rtr_new, rtr)
            return xr, xi, rr, ri, pr, pi, rtr

        zero = jnp.zeros_like(rhs_r)
        xr, xi, *_ = lax.fori_loop(
            0, 10, cg_body, (zero, zero, rhs_r, rhs_i, rhs_r, rhs_i, rtr0))

        outr_ref[...] = xr
        outi_ref[...] = xi

    if resident:
        def kernel(lam_ref, rhsr_ref, rhsi_ref, m2t_ref, fr_ref, fi_ref,
                   csm_ref, outr_ref, outi_ref):
            # csm fully VMEM-resident: (nch, 2, B*cc, N, N) input, no DMA.
            def chunk_loop(update, pr, pi, init):
                if nch == 1:
                    return update(init, csm_ref[0], pr, pi)

                def body(ch, acc):
                    return update(acc, csm_ref[ch], pr, pi)
                return lax.fori_loop(0, nch, body, init, unroll=nch <= 4)

            _shared(lam_ref, rhsr_ref, rhsi_ref, m2t_ref, fr_ref, fi_ref,
                    outr_ref, outi_ref, chunk_loop)
    else:
        def kernel(lam_ref, rhsr_ref, rhsi_ref, m2t_ref, fr_ref, fi_ref,
                   csm_hbm, outr_ref, outi_ref, csm_buf, sem):
            # csm streamed from HBM, one packed DMA per coil chunk,
            # double-buffered; next chunk's DMA is issued before waiting
            # on the current one.
            def start(ch, slot):
                pltpu.make_async_copy(csm_hbm.at[ch], csm_buf.at[slot],
                                      sem.at[slot]).start()

            def wait(ch, slot):
                pltpu.make_async_copy(csm_hbm.at[ch], csm_buf.at[slot],
                                      sem.at[slot]).wait()

            def chunk_loop(update, pr, pi, init):
                start(0, 0)

                def body(ch, acc):
                    slot = lax.rem(ch, 2)

                    @pl.when(ch + 1 < nch)
                    def _():
                        start(ch + 1, 1 - slot)

                    wait(ch, slot)
                    return update(acc, csm_buf[slot], pr, pi)

                return lax.fori_loop(0, nch, body, init)

            _shared(lam_ref, rhsr_ref, rhsi_ref, m2t_ref, fr_ref, fi_ref,
                    outr_ref, outi_ref, chunk_loop)

    return kernel


# --------------------------------------------------------------------------- #
# Wrapper
# --------------------------------------------------------------------------- #
def data_consistency(z_k, x0, csm, mask, lam, *, coil_chunk=None,
                     force_streaming=False):
    """JAX/Pallas equivalent of models.ssdu.data_consistency.forward."""
    B, two, N_in, N_in2 = z_k.shape
    assert two == 2 and N_in == N_in2
    C = csm.shape[1]
    assert csm.shape == (B, C, N_in, N_in) and mask.shape == (B, N_in, N_in)

    # lane/sublane-friendly zero-padding (exact: padded rows/cols stay zero
    # through the orthonormal-DFT normal equations and the CG iterates).
    if N_in % 128 == 0:
        N = N_in
    elif N_in > 128:
        N = ((N_in + 127) // 128) * 128
    else:
        N = ((N_in + 7) // 8) * 8
    pad = N - N_in

    cap = _vmem_capacity_bytes()
    resident, cc, vmem_limit = _plan(B, C, N, cap)
    if force_streaming:
        resident = False
    if coil_chunk is not None:
        assert C % coil_chunk == 0
        cc = coil_chunk
    nch = C // cc

    fr, fi = _dft_mats(N_in, N)

    lam32 = jnp.asarray(lam, jnp.float32)
    # rhs computed in plain XLA (drops 2 VMEM-resident inputs + one VPU pass)
    rhs = x0.astype(jnp.float32) + lam32 * z_k.astype(jnp.float32)
    rhs_r, rhs_i = rhs[:, 0], rhs[:, 1]

    m = mask.astype(jnp.float32)
    # fwd + adj mask fused (mask^2), pre-transposed to match the transposed
    # k-space orientation used inside the kernel.
    m2t = jnp.swapaxes(m * m, -1, -2)

    # packed coil-chunk-major layout: (nch, {re,im}, B*cc, N, N) -> one DMA per
    # chunk in streaming mode, single VMEM input in resident mode.
    csm_r = jnp.real(csm).astype(jnp.float32)
    csm_i = jnp.imag(csm).astype(jnp.float32)
    csm_p = jnp.stack([csm_r, csm_i], axis=0)                    # (2,B,C,N,N)
    csm_p = csm_p.reshape(2, B, nch, cc, N_in, N_in)
    csm_p = csm_p.transpose(2, 0, 1, 3, 4, 5).reshape(nch, 2, B * cc, N_in, N_in)

    if pad:
        pd = ((0, 0), (0, pad), (0, pad))
        rhs_r = jnp.pad(rhs_r, pd)
        rhs_i = jnp.pad(rhs_i, pd)
        m2t = jnp.pad(m2t, pd)
        csm_p = jnp.pad(csm_p, ((0, 0), (0, 0), (0, 0), (0, pad), (0, pad)))

    kernel = _make_dc_kernel(resident, nch, B, cc, N)

    vmem = pl.BlockSpec(memory_space=pltpu.MemorySpace.VMEM)
    smem = pl.BlockSpec(memory_space=pltpu.MemorySpace.SMEM)
    csm_spec = vmem if resident else pl.BlockSpec(memory_space=pl.ANY)

    scratch = []
    if not resident:
        scratch = [pltpu.VMEM((2, 2, B * cc, N, N), jnp.float32),  # double buffer
                   pltpu.SemaphoreType.DMA((2,))]

    out_r, out_i = pl.pallas_call(
        kernel,
        out_shape=(jax.ShapeDtypeStruct((B, N, N), jnp.float32),
                   jax.ShapeDtypeStruct((B, N, N), jnp.float32)),
        in_specs=[smem, vmem, vmem, vmem, vmem, vmem, csm_spec],
        out_specs=(vmem, vmem),
        scratch_shapes=scratch,
        compiler_params=pltpu.CompilerParams(vmem_limit_bytes=vmem_limit),
    )(lam32.reshape(1), rhs_r, rhs_i, m2t, fr, fi, csm_p)

    rec = jnp.stack([out_r, out_i], axis=1)          # c2r(x, axis=1)
    if pad:
        rec = rec[:, :, :N_in, :N_in]
    return rec


# --------------------------------------------------------------------------- #
# Pure-JAX reference (mirrors the PyTorch myCG / myAtA semantics)
# --------------------------------------------------------------------------- #
def _reference(z_k, x0, csm, mask, lam):
    B, _, N, _ = z_k.shape
    idx = jnp.arange(N)
    F = (jnp.exp(1j * (-2.0 * jnp.pi * jnp.outer(idx, idx) / N))
         / jnp.sqrt(N)).astype(jnp.complex64)
    Fc = jnp.conj(F)
    rhs = (x0[:, 0] + lam * z_k[:, 0]) + 1j * (x0[:, 1] + lam * z_k[:, 1])

    def AtA(p):
        coil = csm * p[:, None]
        k = jnp.einsum('ij,bcjk->bcik', F, coil, precision='highest')
        k = jnp.einsum('bcij,jk->bcik', k, F, precision='highest')
        k = k * mask[:, None]
        k = k * mask[:, None]
        im = jnp.einsum('ij,bcjk->bcik', Fc, k, precision='highest')
        im = jnp.einsum('bcij,jk->bcik', im, Fc, precision='highest')
        return jnp.sum(jnp.conj(csm) * im, axis=1) + lam * p

    x = jnp.zeros_like(rhs)
    r = rhs
    p = rhs
    rtr = float(jnp.sum(jnp.conj(r) * r).real)
    i = 0
    while i < 10 and rtr > 1e-10:
        Ap = AtA(p)
        alpha = rtr / float(jnp.sum(jnp.conj(p) * Ap).real)
        x = x + alpha * p
        r = r - alpha * Ap
        rtr_new = float(jnp.sum(jnp.conj(r) * r).real)
        beta = rtr_new / rtr
        p = r + beta * p
        i += 1
        rtr = rtr_new
    return jnp.stack([jnp.real(x), jnp.imag(x)], axis=1)


if __name__ == "__main__":
    B, C, N = 2, 4, 16
    key = jax.random.PRNGKey(0)
    k1, k2, k3, k4, k5 = jax.random.split(key, 5)

    z_k = jax.random.normal(k1, (B, 2, N, N), jnp.float32)
    x0 = jax.random.normal(k2, (B, 2, N, N), jnp.float32)

    csm = (jax.random.normal(k3, (B, C, N, N), jnp.float32)
           + 1j * jax.random.normal(k4, (B, C, N, N), jnp.float32)).astype(jnp.complex64)
    # normalise sensitivities: sum_c |csm|^2 == 1 (standard SENSE convention)
    csm = csm / jnp.sqrt(jnp.sum(jnp.abs(csm) ** 2, axis=1, keepdims=True))

    # deterministic ~50% column undersampling mask, shared across batch
    cols = jax.random.bernoulli(k5, 0.5, (N,)).astype(jnp.float32)
    mask = jnp.broadcast_to(cols[None, None, :], (B, N, N))

    lam = jnp.float32(0.05)   # nn.Parameter(torch.tensor(0.05)) initial value

    ref = _reference(z_k, x0, csm, mask, lam)

    # main path (csm VMEM-resident on all current chips at this size)
    rec = jax.block_until_ready(data_consistency(z_k, x0, csm, mask, lam))
    assert rec.shape == (B, 2, N, N)
    assert bool(jnp.all(jnp.isfinite(rec)))
    err = float(jnp.max(jnp.abs(rec - ref)))
    assert err < 3e-3, err

    # streaming fallback path (forced, double-buffered HBM csm chunks)
    rec_s = jax.block_until_ready(
        data_consistency(z_k, x0, csm, mask, lam,
                         force_streaming=True, coil_chunk=2))
    err_s = float(jnp.max(jnp.abs(rec_s - ref)))
    assert err_s < 3e-3, err_s

    print("KERNEL_OK")
</pallas_src>

<mosaic_0001>
module attributes {stable_mosaic.version = 11 : i64} {
  func.func @kernel(%arg0: memref<1xf32, #tpu.memory_space<smem>>, %arg1: memref<2x16x16xf32, #tpu.memory_space<vmem>>, %arg2: memref<2x16x16xf32, #tpu.memory_space<vmem>>, %arg3: memref<2x16x16xf32, #tpu.memory_space<vmem>>, %arg4: memref<16x16xf32, #tpu.memory_space<vmem>>, %arg5: memref<16x16xf32, #tpu.memory_space<vmem>>, %arg6: memref<1x2x8x16x16xf32, #tpu.memory_space<vmem>>, %arg7: memref<2x16x16xf32, #tpu.memory_space<vmem>>, %arg8: memref<2x16x16xf32, #tpu.memory_space<vmem>>) attributes {dimension_semantics = [], scalar_prefetch = 0 : i64, scratch_operands = 0 : i64, tpu.core_type = #tpu.core_type<tc>} {
    %c0 = arith.constant 0 : index
    %0 = memref.load %arg0[%c0] : memref<1xf32, #tpu.memory_space<smem>>
    %c0_0 = arith.constant 0 : index
    %c0_1 = arith.constant 0 : index
    %1 = vector.load %arg4[%c0_0, %c0_1] : memref<16x16xf32, #tpu.memory_space<vmem>>, vector<16x16xf32>
    %c0_2 = arith.constant 0 : index
    %c0_3 = arith.constant 0 : index
    %2 = vector.load %arg5[%c0_2, %c0_3] : memref<16x16xf32, #tpu.memory_space<vmem>>, vector<16x16xf32>
    %cst = arith.constant 0.000000e+00 : f32
    %3 = vector.broadcast %cst : f32 to vector<16x16xf32>
    %4 = arith.subf %3, %2 : vector<16x16xf32>
    %5 = arith.addf %1, %2 : vector<16x16xf32>
    %6 = arith.subf %1, %2 : vector<16x16xf32>
    %c0_4 = arith.constant 0 : index
    %c0_5 = arith.constant 0 : index
    %c0_6 = arith.constant 0 : index
    %7 = vector.load %arg3[%c0_4, %c0_5, %c0_6] : memref<2x16x16xf32, #tpu.memory_space<vmem>>, vector<2x16x16xf32>
    %c0_7 = arith.constant 0 : index
    %c0_8 = arith.constant 0 : index
    %c0_9 = arith.constant 0 : index
    %8 = vector.load %arg1[%c0_7, %c0_8, %c0_9] : memref<2x16x16xf32, #tpu.memory_space<vmem>>, vector<2x16x16xf32>
    %c0_10 = arith.constant 0 : index
    %c0_11 = arith.constant 0 : index
    %c0_12 = arith.constant 0 : index
    %9 = vector.load %arg2[%c0_10, %c0_11, %c0_12] : memref<2x16x16xf32, #tpu.memory_space<vmem>>, vector<2x16x16xf32>
    %10 = arith.mulf %8, %8 : vector<2x16x16xf32>
    %11 = arith.mulf %9, %9 : vector<2x16x16xf32>
    %12 = arith.addf %10, %11 : vector<2x16x16xf32>
    %13 = vector.shape_cast %12 : vector<2x16x16xf32> to vector<1x2x16x16xf32>
    %cst_13 = arith.constant dense<0.000000e+00> : vector<1xf32>
    %14 = vector.multi_reduction <add>, %13, %cst_13 [1, 2, 3] : vector<1x2x16x16xf32> to vector<1xf32>
    %15 = vector.shape_cast %14 : vector<1xf32> to vector<1x1x1x1xf32>
    %16 = vector.extract %15[0, 0, 0, 0] : f32 from vector<1x1x1x1xf32>
    %cst_14 = arith.constant 0.000000e+00 : f32
    %17 = vector.broadcast %cst_14 : f32 to vector<2x16x16xf32>
    %c0_i32 = arith.constant 0 : i32
    %c10_i32 = arith.constant 10 : i32
    %18 = arith.addi %c0_i32, %c10_i32 : i32
    %c1_i32 = arith.constant 1 : i32
    %19:7 = scf.for %arg9 = %c0_i32 to %18 step %c1_i32 iter_args(%arg10 = %17, %arg11 = %17, %arg12 = %8, %arg13 = %9, %arg14 = %8, %arg15 = %9, %arg16 = %16) -> (vector<2x16x16xf32>, vector<2x16x16xf32>, vector<2x16x16xf32>, vector<2x16x16xf32>, vector<2x16x16xf32>, vector<2x16x16xf32>, f32)  : i32 {
      %22 = vector.broadcast %0 : f32 to vector<2x16x16xf32>
      %23 = arith.mulf %22, %arg14 : vector<2x16x16xf32>
      %24 = vector.broadcast %0 : f32 to vector<2x16x16xf32>
      %25 = arith.mulf %24, %arg15 : vector<2x16x16xf32>
      %c0_21 = arith.constant 0 : index
      %c0_22 = arith.constant 0 : index
      %c0_23 = arith.constant 0 : index
      %c0_24 = arith.constant 0 : index
      %c0_25 = arith.constant 0 : index
      %26 = vector.load %arg6[%c0_21, %c0_22, %c0_23, %c0_24, %c0_25] : memref<1x2x8x16x16xf32, #tpu.memory_space<vmem>>, vector<1x2x8x16x16xf32>
      %27 = vector.shape_cast %26 : vector<1x2x8x16x16xf32> to vector<2x8x16x16xf32>
      %28 = vector.extract_strided_slice %27 {offsets = [0, 0, 0, 0], sizes = [1, 8, 16, 16], strides = [1, 1, 1, 1]} : vector<2x8x16x16xf32> to vector<1x8x16x16xf32>
      %29 = vector.shape_cast %28 : vector<1x8x16x16xf32> to vector<8x16x16xf32>
      %30 = vector.shape_cast %29 : vector<8x16x16xf32> to vector<2x4x16x16xf32>
      %31 = vector.extract_strided_slice %27 {offsets = [1, 0, 0, 0], sizes = [1, 8, 16, 16], strides = [1, 1, 1, 1]} : vector<2x8x16x16xf32> to vector<1x8x16x16xf32>
      %32 = vector.shape_cast %31 : vector<1x8x16x16xf32> to vector<8x16x16xf32>
      %33 = vector.shape_cast %32 : vector<8x16x16xf32> to vector<2x4x16x16xf32>
      %34 = vector.shape_cast %arg14 : vector<2x16x16xf32> to vector<2x1x16x16xf32>
      %35 = vector.broadcast %34 : vector<2x1x16x16xf32> to vector<2x4x16x16xf32>
      %36 = arith.mulf %30, %35 : vector<2x4x16x16xf32>
      %37 = vector.shape_cast %arg15 : vector<2x16x16xf32> to vector<2x1x16x16xf32>
      %38 = vector.broadcast %37 : vector<2x1x16x16xf32> to vector<2x4x16x16xf32>
      %39 = arith.mulf %33, %38 : vector<2x4x16x16xf32>
      %40 = arith.subf %36, %39 : vector<2x4x16x16xf32>
      %41 = vector.shape_cast %40 : vector<2x4x16x16xf32> to vector<8x16x16xf32>
      %42 = vector.shape_cast %arg15 : vector<2x16x16xf32> to vector<2x1x16x16xf32>
      %43 = vector.broadcast %42 : vector<2x1x16x16xf32> to vector<2x4x16x16xf32>
      %44 = arith.mulf %30, %43 : vector<2x4x16x16xf32>
      %45 = vector.shape_cast %arg14 : vector<2x16x16xf32> to vector<2x1x16x16xf32>
      %46 = vector.broadcast %45 : vector<2x1x16x16xf32> to vector<2x4x16x16xf32>
      %47 = arith.mulf %33, %46 : vector<2x4x16x16xf32>
      %48 = arith.addf %44, %47 : vector<2x4x16x16xf32>
      %49 = vector.shape_cast %48 : vector<2x4x16x16xf32> to vector<8x16x16xf32>
      %50 = vector.shape_cast %41 : vector<8x16x16xf32> to vector<128x16xf32>
      %51 = vector.shape_cast %49 : vector<8x16x16xf32> to vector<128x16xf32>
      %cst_26 = arith.constant dense<0.000000e+00> : vector<128x16xf32>
      %52 = tpu.matmul %50, %1, %cst_26 {dimension_numbers = #tpu.dot_dimension_numbers<[1], [0], [0], [1], [0, 0, 1, 1], [], []>} : vector<128x16xf32>, vector<16x16xf32>, vector<128x16xf32> -> vector<128x16xf32>
      %cst_27 = arith.constant dense<0.000000e+00> : vector<128x16xf32>
      %53 = tpu.matmul %51, %2, %cst_27 {dimension_numbers = #tpu.dot_dimension_numbers<[1], [0], [0], [1], [0, 0, 1, 1], [], []>} : vector<128x16xf32>, vector<16x16xf32>, vector<128x16xf32> -> vector<128x16xf32>
      %54 = arith.addf %50, %51 : vector<128x16xf32>
      %cst_28 = arith.constant dense<0.000000e+00> : vector<128x16xf32>
      %55 = tpu.matmul %54, %5, %cst_28 {dimension_numbers = #tpu.dot_dimension_numbers<[1], [0], [0], [1], [0, 0, 1, 1], [], []>} : vector<128x16xf32>, vector<16x16xf32>, vector<128x16xf32> -> vector<128x16xf32>
      %56 = arith.subf %52, %53 : vector<128x16xf32>
      %57 = vector.shape_cast %56 : vector<128x16xf32> to vector<8x16x16xf32>
      %58 = arith.subf %55, %52 : vector<128x16xf32>
      %59 = arith.subf %58, %53 : vector<128x16xf32>
      %60 = vector.shape_cast %59 : vector<128x16xf32> to vector<8x16x16xf32>
      %61 = tpu.transpose %57, [0, 2, 1] : vector<8x16x16xf32> -> vector<8x16x16xf32>
      %62 = tpu.transpose %60, [0, 2, 1] : vector<8x16x16xf32> -> vector<8x16x16xf32>
      %63 = vector.shape_cast %61 : vector<8x16x16xf32> to vector<128x16xf32>
      %64 = vector.shape_cast %62 : vector<8x16x16xf32> to vector<128x16xf32>
      %cst_29 = arith.constant dense<0.000000e+00> : vector<128x16xf32>
      %65 = tpu.matmul %63, %1, %cst_29 {dimension_numbers = #tpu.dot_dimension_numbers<[1], [0], [0], [1], [0, 0, 1, 1], [], []>} : vector<128x16xf32>, vector<16x16xf32>, vector<128x16xf32> -> vector<128x16xf32>
      %cst_30 = arith.constant dense<0.000000e+00> : vector<128x16xf32>
      %66 = tpu.matmul %64, %2, %cst_30 {dimension_numbers = #tpu.dot_dimension_numbers<[1], [0], [0], [1], [0, 0, 1, 1], [], []>} : vector<128x16xf32>, vector<16x16xf32>, vector<128x16xf32> -> vector<128x16xf32>
      %67 = arith.addf %63, %64 : vector<128x16xf32>
      %cst_31 = arith.constant dense<0.000000e+00> : vector<128x16xf32>
      %68 = tpu.matmul %67, %5, %cst_31 {dimension_numbers = #tpu.dot_dimension_numbers<[1], [0], [0], [1], [0, 0, 1, 1], [], []>} : vector<128x16xf32>, vector<16x16xf32>, vector<128x16xf32> -> vector<128x16xf32>
      %69 = arith.subf %65, %66 : vector<128x16xf32>
      %70 = vector.shape_cast %69 : vector<128x16xf32> to vector<8x16x16xf32>
      %71 = arith.subf %68, %65 : vector<128x16xf32>
      %72 = arith.subf %71, %66 : vector<128x16xf32>
      %73 = vector.shape_cast %72 : vector<128x16xf32> to vector<8x16x16xf32>
      %74 = vector.shape_cast %70 : vector<8x16x16xf32> to vector<2x4x16x16xf32>
      %75 = vector.shape_cast %7 : vector<2x16x16xf32> to vector<2x1x16x16xf32>
      %76 = vector.broadcast %75 : vector<2x1x16x16xf32> to vector<2x4x16x16xf32>
      %77 = arith.mulf %74, %76 : vector<2x4x16x16xf32>
      %78 = vector.shape_cast %77 : vector<2x4x16x16xf32> to vector<8x16x16xf32>
      %79 = vector.shape_cast %73 : vector<8x16x16xf32> to vector<2x4x16x16xf32>
      %80 = vector.shape_cast %7 : vector<2x16x16xf32> to vector<2x1x16x16xf32>
      %81 = vector.broadcast %80 : vector<2x1x16x16xf32> to vector<2x4x16x16xf32>
      %82 = arith.mulf %79, %81 : vector<2x4x16x16xf32>
      %83 = vector.shape_cast %82 : vector<2x4x16x16xf32> to vector<8x16x16xf32>
      %84 = vector.shape_cast %78 : vector<8x16x16xf32> to vector<128x16xf32>
      %85 = vector.shape_cast %83 : vector<8x16x16xf32> to vector<128x16xf32>
      %cst_32 = arith.constant dense<0.000000e+00> : vector<128x16xf32>
      %86 = tpu.matmul %84, %1, %cst_32 {dimension_numbers = #tpu.dot_dimension_numbers<[1], [0], [0], [1], [0, 0, 1, 1], [], []>} : vector<128x16xf32>, vector<16x16xf32>, vector<128x16xf32> -> vector<128x16xf32>
      %cst_33 = arith.constant dense<0.000000e+00> : vector<128x16xf32>
      %87 = tpu.matmul %85, %4, %cst_33 {dimension_numbers = #tpu.dot_dimension_numbers<[1], [0], [0], [1], [0, 0, 1, 1], [], []>} : vector<128x16xf32>, vector<16x16xf32>, vector<128x16xf32> -> vector<128x16xf32>
      %88 = arith.addf %84, %85 : vector<128x16xf32>
      %cst_34 = arith.constant dense<0.000000e+00> : vector<128x16xf32>
      %89 = tpu.matmul %88, %6, %cst_34 {dimension_numbers = #tpu.dot_dimension_numbers<[1], [0], [0], [1], [0, 0, 1, 1], [], []>} : vector<128x16xf32>, vector<16x16xf32>, vector<128x16xf32> -> vector<128x16xf32>
      %90 = arith.subf %86, %87 : vector<128x16xf32>
      %91 = vector.shape_cast %90 : vector<128x16xf32> to vector<8x16x16xf32>
      %92 = arith.subf %89, %86 : vector<128x16xf32>
      %93 = arith.subf %92, %87 : vector<128x16xf32>
      %94 = vector.shape_cast %93 : vector<128x16xf32> to vector<8x16x16xf32>
      %95 = tpu.transpose %91, [0, 2, 1] : vector<8x16x16xf32> -> vector<8x16x16xf32>
      %96 = tpu.transpose %94, [0, 2, 1] : vector<8x16x16xf32> -> vector<8x16x16xf32>
      %97 = vector.shape_cast %95 : vector<8x16x16xf32> to vector<128x16xf32>
      %98 = vector.shape_cast %96 : vector<8x16x16xf32> to vector<128x16xf32>
      %cst_35 = arith.constant dense<0.000000e+00> : vector<128x16xf32>
      %99 = tpu.matmul %97, %1, %cst_35 {dimension_numbers = #tpu.dot_dimension_numbers<[1], [0], [0], [1], [0, 0, 1, 1], [], []>} : vector<128x16xf32>, vector<16x16xf32>, vector<128x16xf32> -> vector<128x16xf32>
      %cst_36 = arith.constant dense<0.000000e+00> : vector<128x16xf32>
      %100 = tpu.matmul %98, %4, %cst_36 {dimension_numbers = #tpu.dot_dimension_numbers<[1], [0], [0], [1], [0, 0, 1, 1], [], []>} : vector<128x16xf32>, vector<16x16xf32>, vector<128x16xf32> -> vector<128x16xf32>
      %101 = arith.addf %97, %98 : vector<128x16xf32>
      %cst_37 = arith.constant dense<0.000000e+00> : vector<128x16xf32>
      %102 = tpu.matmul %101, %6, %cst_37 {dimension_numbers = #tpu.dot_dimension_numbers<[1], [0], [0], [1], [0, 0, 1, 1], [], []>} : vector<128x16xf32>, vector<16x16xf32>, vector<128x16xf32> -> vector<128x16xf32>
      %103 = arith.subf %99, %100 : vector<128x16xf32>
      %104 = vector.shape_cast %103 : vector<128x16xf32> to vector<8x16x16xf32>
      %105 = arith.subf %102, %99 : vector<128x16xf32>
      %106 = arith.subf %105, %100 : vector<128x16xf32>
      %107 = vector.shape_cast %106 : vector<128x16xf32> to vector<8x16x16xf32>
      %108 = vector.shape_cast %104 : vector<8x16x16xf32> to vector<2x4x16x16xf32>
      %109 = vector.shape_cast %107 : vector<8x16x16xf32> to vector<2x4x16x16xf32>
      %110 = arith.mulf %30, %108 : vector<2x4x16x16xf32>
      %111 = arith.mulf %33, %109 : vector<2x4x16x16xf32>
      %112 = arith.addf %110, %111 : vector<2x4x16x16xf32>
      %cst_38 = arith.constant dense<0.000000e+00> : vector<2x16x16xf32>
      %113 = vector.multi_reduction <add>, %112, %cst_38 [1] : vector<2x4x16x16xf32> to vector<2x16x16xf32>
      %114 = arith.addf %23, %113 : vector<2x16x16xf32>
      %115 = arith.mulf %30, %109 : vector<2x4x16x16xf32>
      %116 = arith.mulf %33, %108 : vector<2x4x16x16xf32>
      %117 = arith.subf %115, %116 : vector<2x4x16x16xf32>
      %cst_39 = arith.constant dense<0.000000e+00> : vector<2x16x16xf32>
      %118 = vector.multi_reduction <add>, %117, %cst_39 [1] : vector<2x4x16x16xf32> to vector<2x16x16xf32>
      %119 = arith.addf %25, %118 : vector<2x16x16xf32>
      %cst_40 = arith.constant 1.000000e-10 : f32
      %120 = arith.cmpf ogt, %arg16, %cst_40 : f32
      %121 = arith.mulf %arg14, %114 : vector<2x16x16xf32>
      %122 = arith.mulf %arg15, %119 : vector<2x16x16xf32>
      %123 = arith.addf %121, %122 : vector<2x16x16xf32>
      %124 = vector.shape_cast %123 : vector<2x16x16xf32> to vector<1x2x16x16xf32>
      %cst_41 = arith.constant dense<0.000000e+00> : vector<1xf32>
      %125 = vector.multi_reduction <add>, %124, %cst_41 [1, 2, 3] : vector<1x2x16x16xf32> to vector<1xf32>
      %126 = vector.shape_cast %125 : vector<1xf32> to vector<1x1x1x1xf32>
      %127 = vector.extract %126[0, 0, 0, 0] : f32 from vector<1x1x1x1xf32>
      %cst_42 = arith.constant 1.000000e+00 : f32
      %128 = arith.select %120, %127, %cst_42 : f32
      %129 = arith.divf %arg16, %128 : f32
      %cst_43 = arith.constant 0.000000e+00 : f32
      %130 = arith.select %120, %129, %cst_43 : f32
      %131 = vector.broadcast %130 : f32 to vector<2x16x16xf32>
      %132 = arith.mulf %131, %arg14 : vector<2x16x16xf32>
      %133 = arith.addf %arg10, %132 : vector<2x16x16xf32>
      %134 = vector.broadcast %130 : f32 to vector<2x16x16xf32>
      %135 = arith.mulf %134, %arg15 : vector<2x16x16xf32>
      %136 = arith.addf %arg11, %135 : vector<2x16x16xf32>
      %137 = vector.broadcast %130 : f32 to vector<2x16x16xf32>
      %138 = arith.mulf %137, %114 : vector<2x16x16xf32>
      %139 = arith.subf %arg12, %138 : vector<2x16x16xf32>
      %140 = vector.broadcast %130 : f32 to vector<2x16x16xf32>
      %141 = arith.mulf %140, %119 : vector<2x16x16xf32>
      %142 = arith.subf %arg13, %141 : vector<2x16x16xf32>
      %143 = arith.mulf %139, %139 : vector<2x16x16xf32>
      %144 = arith.mulf %142, %142 : vector<2x16x16xf32>
      %145 = arith.addf %143, %144 : vector<2x16x16xf32>
      %146 = vector.shape_cast %145 : vector<2x16x16xf32> to vector<1x2x16x16xf32>
      %cst_44 = arith.constant dense<0.000000e+00> : vector<1xf32>
      %147 = vector.multi_reduction <add>, %146, %cst_44 [1, 2, 3] : vector<1x2x16x16xf32> to vector<1xf32>
      %148 = vector.shape_cast %147 : vector<1xf32> to vector<1x1x1x1xf32>
      %149 = vector.extract %148[0, 0, 0, 0] : f32 from vector<1x1x1x1xf32>
      %cst_45 = arith.constant 1.000000e+00 : f32
      %150 = arith.select %120, %arg16, %cst_45 : f32
      %151 = arith.divf %149, %150 : f32
      %cst_46 = arith.constant 0.000000e+00 : f32
      %152 = arith.select %120, %151, %cst_46 : f32
      %153 = vector.broadcast %152 : f32 to vector<2x16x16xf32>
      %154 = arith.mulf %153, %arg14 : vector<2x16x16xf32>
      %155 = arith.addf %139, %154 : vector<2x16x16xf32>
      %156 = vector.broadcast %152 : f32 to vector<2x16x16xf32>
      %157 = arith.mulf %156, %arg15 : vector<2x16x16xf32>
      %158 = arith.addf %142, %157 : vector<2x16x16xf32>
      %159 = arith.select %120, %149, %arg16 : f32
      scf.yield %133, %136, %139, %142, %155, %158, %159 : vector<2x16x16xf32>, vector<2x16x16xf32>, vector<2x16x16xf32>, vector<2x16x16xf32>, vector<2x16x16xf32>, vector<2x16x16xf32>, f32
    }
    %c0_15 = arith.constant 0 : index
    %c0_16 = arith.constant 0 : index
    %c0_17 = arith.constant 0 : index
    %20 = vector.load %arg7[%c0_15, %c0_16, %c0_17] : memref<2x16x16xf32, #tpu.memory_space<vmem>>, vector<2x16x16xf32>
    tpu.vector_store %arg7[%c0_15, %c0_16, %c0_17], %19#0 {strides = array<i32>} : memref<2x16x16xf32, #tpu.memory_space<vmem>>, vector<2x16x16xf32>,
    %c0_18 = arith.constant 0 : index
    %c0_19 = arith.constant 0 : index
    %c0_20 = arith.constant 0 : index
    %21 = vector.load %arg8[%c0_18, %c0_19, %c0_20] : memref<2x16x16xf32, #tpu.memory_space<vmem>>, vector<2x16x16xf32>
    tpu.vector_store %arg8[%c0_18, %c0_19, %c0_20], %19#1 {strides = array<i32>} : memref<2x16x16xf32, #tpu.memory_space<vmem>>, vector<2x16x16xf32>,
    return
  }
}

</mosaic_0001>

<bundles_post_ra>
// kernel: tpu_custom_call.1
= control target key start
LH: loop header
LB: loop body
LE: loop exit
PB: predicated region body
PF: predicated region fallthrough
CT: control target
= control target key end

     0   :  { %15 = vsyncpa [#allocation4], 0  ;;  %s5221_s0 = inlined_call_operand.<no memory space> [shape: f32[1], index: 0, kind: input, shape index: {}]   ;;  %s5222_s1 = inlined_call_operand.hbm [shape: f32[2,16,16], index: 1, kind: input, shape index: {}]   ;;  %s5223_s2 = inlined_call_operand.hbm [shape: f32[2,16,16], index: 2, kind: input, shape index: {}]   ;;  %s5224_s3 = inlined_call_operand.hbm [shape: f32[2,16,16], index: 3, kind: input, shape index: {}]   ;;  %s5225_s4 = inlined_call_operand.hbm [shape: f32[16,16], index: 4, kind: input, shape index: {}]   ;;  %s5226_s5 = inlined_call_operand.hbm [shape: f32[16,16], index: 5, kind: input, shape index: {}]   ;;  %s5227_s6 = inlined_call_operand.hbm [shape: f32[1,2,8,16,16], index: 6, kind: input, shape index: {}]   ;;  %s5228_s7 = inlined_call_operand.hbm [shape: f32[2,16,16], index: 7, kind: output, shape index: {0}]   ;;  %s5229_s8 = inlined_call_operand.hbm [shape: f32[2,16,16], index: 8, kind: output, shape index: {1}]  }
   0x1   :  { %16 = vsyncpa [#allocation7], 0 }
   0x2   :  { %17 = vsyncpa [#allocation10], 0 }
   0x3   :  { %18 = vsyncpa [#allocation13], 0 }
   0x4   :  { %19 = vsyncpa [#allocation5], 0 }
   0x5   :  { %20 = vsyncpa [#allocation16], 0  ;;  %s40_s29 = sshll.u32 %s5223_s2, 4  ;;  %s4316_s30 = smov [#allocation6]   ;;  %s41_s29 = int_to_ptr.hbm [resolvable:$true] %s40_s29 }
   0x6   :  { %s42_s9 = sshll.u32 %s4316_s30, 4  ;;  %s66_s12 = sshll.u32 %s5225_s4, 4  ;;  %s43_s9 = int_to_ptr.vmem [resolvable:$true] %s42_s9  ;;  %s67_s12 = int_to_ptr.hbm [resolvable:$true] %s66_s12 }
   0x7   :  { %s4317_s13 = smov 128   ;;  %s4318_s14 = smov 8  }
   0x8   :  { %48 = dma.hbm_to_vmem [thread:$0]  %s41_s29, 512, %s43_s9, [#allocation7], %s4317_s13, %s4317_s13, %s4318_s14  }
   0x9   :  { %s4319_s15 = smov [#allocation9]   ;;  %s27_s2 = sshll.u32 %s5222_s1, 4  ;;  %s28_s2 = int_to_ptr.hbm [resolvable:$true] %s27_s2 }
   0xa   :  { %s68_s16 = sshll.u32 %s4319_s15, 4  ;;  %s53_s20 = sshll.u32 %s5224_s3, 4  ;;  %s69_s16 = int_to_ptr.vmem [resolvable:$true] %s68_s16  ;;  %s54_s20 = int_to_ptr.hbm [resolvable:$true] %s53_s20 }
   0xb   :  { %74 = dma.hbm_to_vmem [thread:$0]  %s67_s12, 256, %s69_s16, [#allocation10], %s4317_s13, %s4317_s13, %s4318_s14  }
   0xc   :  { %s4320_s21 = smov [#allocation3]   ;;  %s4321_s23 = smov [#allocation8]  }
   0xd   :  { %s29_s22 = sshll.u32 %s4320_s21, 4  ;;  %s55_s1 = sshll.u32 %s4321_s23, 4  ;;  %s30_s22 = int_to_ptr.vmem [resolvable:$true] %s29_s22  ;;  %s56_s1 = int_to_ptr.vmem [resolvable:$true] %s55_s1 }
   0xe   :  { %35 = dma.hbm_to_vmem [thread:$0]  %s28_s2, 512, %s30_s22, [#allocation4], %s4317_s13, %s4317_s13, %s4318_s14  }
   0xf   :  { %s79_s26 = sshll.u32 %s5226_s5, 4  ;;  %s92_s28 = sshll.u32 %s5227_s6, 4  ;;  %s80_s26 = int_to_ptr.hbm [resolvable:$true] %s79_s26  ;;  %s93_s28 = int_to_ptr.hbm [resolvable:$true] %s92_s28 }
  0x10   :  { %61 = dma.hbm_to_vmem [thread:$0]  %s54_s20, 512, %s56_s1, [#allocation7], %s4317_s13, %s4317_s13, %s4318_s14  }
  0x11   :  { %s4322_s29 = smov [#allocation11]   ;;  %s4323_s9 = smov [#allocation12]  }
  0x12   :  { %s81_s30 = sshll.u32 %s4322_s29, 4  ;;  %s94_s5 = sshll.u32 %s4323_s9, 4  ;;  %s82_s30 = int_to_ptr.vmem [resolvable:$true] %s81_s30  ;;  %s95_s5 = int_to_ptr.vmem [resolvable:$true] %s94_s5 }
  0x13   :  { %87 = dma.hbm_to_vmem [thread:$0]  %s80_s26, 256, %s82_s30, [#allocation10], %s4317_s13, %s4317_s13, %s4318_s14  }
  0x14   :  { %100 = dma.hbm_to_vmem [thread:$0]  %s93_s28, 4096, %s95_s5, [#allocation13], %s4317_s13, %s4317_s13, %s4318_s14  }
  0x15   :  { %4200 = dma.done.wait [#allocation4], 512  }
  0x16   :  { %4201 = vsyncadd [#allocation4], 4294966784 }
  0x17   :  { %4202 = dma.done.wait [#allocation7], 1024  }
  0x18   :  { %4203 = vsyncadd [#allocation7], 4294966272 }
  0x19   :  { %4204 = dma.done.wait [#allocation10], 512  }
  0x1a   :  { %4205 = vsyncadd [#allocation10], 4294966784 }
  0x1b   :  { %4206 = dma.done.wait [#allocation13], 4096  }
  0x1c   :  { %4207 = vsyncadd [#allocation13], 4294963200  ;;  %v4407_v0 = vld [vmem:[#allocation9] sm:$0xff]  ;;  %v4409_v1 = vld [vmem:[#allocation9 + $0x8] sm:$0xff]  ;;  %vm160_vm0 = vcmask 130048   ;;  %v4479_v56 = vmov 0.0  }
  0x1d   :  { %5246 = vst [vmem:[#allocation23_spill] sm:$0xff] %v4407_v0  ;;  %v4411_v2 = vld [vmem:[#allocation11] sm:$0xff]  ;;  %v4413_v3 = vld [vmem:[#allocation11 + $0x8] sm:$0xff]  ;;  %v4424_v7 = vld [vmem:[#allocation8] sm:$0xff]  ;;  %v4481_v57 = vmov 0.0   ;;  %v4483_v58 = vmov 0.0  }
  0x1e   :  { %5247 = vst [vmem:[#allocation24_spill] sm:$0xff] %v4409_v1  ;;  %v4418_v5 = vadd.f32 %v4411_v2, %v4407_v0  ;;  %v4422_v6 = vsub.f32 %v4407_v0, %v4411_v2  ;;  %v4426_v8 = vld [vmem:[#allocation8 + $0x8] sm:$0xff]  ;;  %v4431_v10 = vadd.f32 %v4413_v3, %v4409_v1  ;;  %v4435_v11 = vsub.f32 %v4409_v1, %v4413_v3  ;;  %v4437_v12 = vld [vmem:[#allocation8 + $0x10] sm:$0xff]  ;;  %v4439_v13 = vld [vmem:[#allocation8 + $0x18] sm:$0xff]  ;;  %s4495_s10 = smov 0  }
  0x1f   :  { %5248 = vst [vmem:[#allocation25_spill] sm:$0xff] %v4411_v2  ;;  %v140_v14 = vld [vmem:[#allocation3] sm:$0xff]   ;;  %v141_v15 = vld [vmem:[#allocation3 + $0x8] sm:$0xff]   ;;  %v142_v16 = vld [vmem:[#allocation3 + $0x10] sm:$0xff]   ;;  %v4485_v59 = vmov 0.0   ;;  %v4487_v60 = vmov 0.0  }
  0x20   :  { %5249 = vst [vmem:[#allocation26_spill] sm:$0xff] %v4413_v3  ;;  %v143_v17 = vld [vmem:[#allocation3 + $0x18] sm:$0xff]   ;;  %v148_v18 = vmul.f32 %v140_v14, %v140_v14  ;;  %v144_v19 = vld [vmem:[#allocation6] sm:$0xff]   ;;  %v145_v20 = vld [vmem:[#allocation6 + $0x8] sm:$0xff]   ;;  %v149_v22 = vmul.f32 %v141_v15, %v141_v15  ;;  %v150_v23 = vmul.f32 %v142_v16, %v142_v16  ;;  %v5263_v53 = vmov %v142_v16 }
  0x21   :  { %5250 = vst [vmem:[#allocation27_spill] sm:$0xff] %v4418_v5  ;;  %v146_v21 = vld [vmem:[#allocation6 + $0x10] sm:$0xff]   ;;  %v151_v24 = vmul.f32 %v143_v17, %v143_v17  ;;  %v147_v25 = vld [vmem:[#allocation6 + $0x18] sm:$0xff]   ;;  %v152_v26 = vmul.f32 %v144_v19, %v144_v19  ;;  %v153_v27 = vmul.f32 %v145_v20, %v145_v20  ;;  %v5260_v50 = vmov %v145_v20 }
  0x22   :  { %5251 = vst [vmem:[#allocation28_spill] sm:$0xff] %v4422_v6  ;;  %v154_v28 = vmul.f32 %v146_v21, %v146_v21  ;;  %v155_v29 = vmul.f32 %v147_v25, %v147_v25  ;;  %v5258_v48 = vmov %v147_v25  ;;  %v5259_v49 = vmov %v146_v21 }
  0x23   :  { %5252 = vst [vmem:[#allocation29_spill] sm:$0xff] %v4424_v7  ;;  %v156_v30 = vadd.f32 %v152_v26, %v148_v18  ;;  %v157_v31 = vadd.f32 %v153_v27, %v149_v22  ;;  %v5261_v51 = vmov %v144_v19  ;;  %v5262_v52 = vmov %v143_v17 }
  0x24   :  { %5253 = vst [vmem:[#allocation30_spill] sm:$0xff] %v4426_v8  ;;  %v158_v32 = vadd.f32 %v154_v28, %v150_v23  ;;  %v159_v33 = vadd.f32 %v155_v29, %v151_v24  ;;  %v5264_v54 = vmov %v141_v15  ;;  %v5265_v55 = vmov %v140_v14 }
  0x25   :  { %5254 = vst [vmem:[#allocation31_spill] sm:$0xff] %v4431_v10  ;;  %v161_v34 = vsel %vm160_vm0, %v156_v30, 0.0  ;;  %v162_v35 = vsel %vm160_vm0, %v157_v31, 0.0  ;;  %v4489_v61 = vmov 0.0   ;;  %v4491_v62 = vmov 0.0  }
  0x26   :  { %5255 = vst [vmem:[#allocation32_spill] sm:$0xff] %v4435_v11  ;;  %v164_v36 = vsel %vm160_vm0, %v158_v32, 0.0  ;;  %v163_v37 = vadd.f32 %v162_v35, %v161_v34  ;;  %v166_v38 = vsel %vm160_vm0, %v159_v33, 0.0  ;;  %v4493_v63 = vmov 0.0  }
  0x27   :  { %5256 = vst [vmem:[#allocation33_spill] sm:$0xff] %v4437_v12 }
  0x28   :  { %5257 = vst [vmem:[#allocation34_spill] sm:$0xff] %v4439_v13  ;;  %v165_v39 = vadd.f32 %v164_v36, %v163_v37 }
  0x2a   :  { %v167_v40 = vadd.f32 %v166_v38, %v165_v39 }
  0x2c   :  { %168 = vadd.xlane.f32.xlu0 %v167_v40 }
  0x9f   :  { %v169_v41 = vpop.xlane.xlu0 %168 }
  0xa0   :  { %v170_v42 = vrot.slane %v169_v41, 4 }
  0xa2   :  { %v171_v43 = vadd.f32 %v170_v42, %v169_v41 }
  0xa4   :  { %v172_v44 = vrot.slane %v171_v43, 2 }
  0xa6   :  { %v173_v45 = vadd.f32 %v172_v44, %v171_v43 }
  0xa8   :  { %v174_v46 = vrot.slane %v173_v45, 1 }
  0xaa   :  { %v175_v47 = vadd.f32 %v174_v46, %v173_v45 }
  0xac   :  { %3639 = vpush %v175_v47 }
  0xdd   :  { %s3640_s6 = spop %3639  }
  0xde LB: > { %v5266_v13 = vld [vmem:[#allocation34_spill] sm:$0xff]  ;;  %v5267_v12 = vld [vmem:[#allocation33_spill] sm:$0xff]  ;;  %v5268_v11 = vld [vmem:[#allocation32_spill] sm:$0xff]  ;;  %5278 = vst [vmem:[#allocation35_spill] sm:$0xff] %v4250_v25  ;;  %p3173_p0 = scmp.gt.f32.partialorder %s4214_s6, 1e-10  ;;  %v4258_v20 = vphi %v145_v20, %v5066_v20   ;;  %v4254_v21 = vphi %v146_v21, %v5069_v21   ;;  %v4250_v25 = vphi %v147_v25, %v5072_v25   ;;  %v4246_v55 = vphi %v5265_v55, %v3306_v55   ;;  %v4242_v54 = vphi %v5264_v54, %v3307_v54   ;;  %v4238_v53 = vphi %v5263_v53, %v3308_v53   ;;  %v4234_v52 = vphi %v5262_v52, %v3309_v52   ;;  %v4230_v51 = vphi %v5261_v51, %v3314_v51   ;;  %v4226_v50 = vphi %v5260_v50, %v3315_v50   ;;  %v4222_v49 = vphi %v5259_v49, %v3316_v49   ;;  %v4218_v48 = vphi %v5258_v48, %v3317_v48   ;;  %s4214_s6 = sphi %s3640_s6, %s5301_s6   ;;  %s4314_s10 = sphi %s4495_s10, %s182_s10   ;;  %v4310_v63 = vphi %v4493_v63, %v5310_v63   ;;  %v4306_v62 = vphi %v4491_v62, %v5309_v62   ;;  %v4302_v61 = vphi %v4489_v61, %v5308_v61   ;;  %v4298_v60 = vphi %v4487_v60, %v5307_v60   ;;  %v4294_v59 = vphi %v4485_v59, %v5306_v59   ;;  %v4290_v58 = vphi %v4483_v58, %v5305_v58   ;;  %v4286_v57 = vphi %v4481_v57, %v5304_v57   ;;  %v4282_v56 = vphi %v4479_v56, %v5303_v56   ;;  %v4278_v14 = vphi %v140_v14, %v5051_v14   ;;  %v4274_v15 = vphi %v141_v15, %v5054_v15   ;;  %v4270_v16 = vphi %v142_v16, %v5057_v16   ;;  %v4266_v17 = vphi %v143_v17, %v5302_v17   ;;  %v4262_v19 = vphi %v144_v19, %v5063_v19  }
  0xdf   : > { %v5269_v10 = vld [vmem:[#allocation31_spill] sm:$0xff]  ;;  %v5270_v8 = vld [vmem:[#allocation30_spill] sm:$0xff]  ;;  %v5271_v7 = vld [vmem:[#allocation29_spill] sm:$0xff]  ;;  %5279 = vst [vmem:[#allocation36_spill] sm:$0xff] %v4254_v21  ;;  %s182_s10 = sadd.s32 1, %s4314_s10  }
  0xe0   : > { %v5272_v6 = vld [vmem:[#allocation28_spill] sm:$0xff]  ;;  %v5273_v5 = vld [vmem:[#allocation27_spill] sm:$0xff]  ;;  %v5274_v3 = vld [vmem:[#allocation26_spill] sm:$0xff]  ;;  %5280 = vst [vmem:[#allocation37_spill] sm:$0xff] %v4258_v20  ;;  %649 = vmatpush.msra.mxu2 %v5269_v10  ;;  %s3282_s18 = scalar_select %p3173_p0, %s4214_s6, 1.0 }
  0xe1   : > { %v5275_v2 = vld [vmem:[#allocation25_spill] sm:$0xff]  ;;  %v5276_v1 = vld [vmem:[#allocation24_spill] sm:$0xff]  ;;  %v5277_v0 = vld [vmem:[#allocation23_spill] sm:$0xff]  ;;  %5281 = vst [vmem:[#allocation38_spill] sm:$0xff] %v4262_v19  ;;  %520 = vmatpush.msra.mxu1 %v5274_v3  ;;  %v5284_v9 = vsub.f32 0.0, %v5274_v3  ;;  %p5119_p1 = scmp.ge.s32.totalorder %s182_s10, 10  }
  0xe2   : > { %5282 = vst [vmem:[#allocation39_spill] sm:$0xff] %v4266_v17  ;;  %407 = vmatpush.msra.mxu0 %v5276_v1  ;;  %v217_v18 = vld [vmem:[#allocation12] sm:$0xff]  ;;  %v218_v23 = vld [vmem:[#allocation12 + $0x8] sm:$0xff]  ;;  %1322 = vmatpush.msra.mxu3 %v5276_v1  ;;  %v219_v39 = vld [vmem:[#allocation12 + $0x10] sm:$0xff]  ;;  %v5285_v4 = vsub.f32 0.0, %v5275_v2  ;;  %s3333_s1 = sshll.u32 (%p5119_p1), %s5228_s7, 4  ;;  %s3334_s1 = int_to_ptr.hbm [resolvable:$true] %s3333_s1 }
  0xe3   : > { %5283 = vst [vmem:[#allocation40_spill] sm:$0xff] %v4270_v16  ;;  %v233_v22 = vld [vmem:[#allocation12 + $0x80] sm:$0xff]  ;;  %v234_v24 = vld [vmem:[#allocation12 + $0x88] sm:$0xff]  ;;  %650 = vmatpush.msra.mxu2 %v5273_v5  ;;  %v249_v26 = vmul.f32 %v4246_v55, %v217_v18  ;;  %v297_v28 = vmul.f32 %v4230_v51, %v217_v18  ;;  %521 = vmatpush.msra.mxu1 %v5275_v2  ;;  %v235_v40 = vld [vmem:[#allocation12 + $0x90] sm:$0xff]  ;;  %s4324_s24 = smov (%p5119_p1), [#allocation14]   ;;  %s3346_s28 = sshll.u32 (%p5119_p1), %s5229_s8, 4  ;;  %s3347_s28 = int_to_ptr.hbm [resolvable:$true] %s3346_s28 }
  0xe4   : > { %v265_v27 = vmul.f32 %v4230_v51, %v233_v22  ;;  %v313_v29 = vmul.f32 %v4246_v55, %v233_v22  ;;  %408 = vmatpush.msra.mxu0 %v5277_v0  ;;  %v250_v30 = vmul.f32 %v4242_v54, %v218_v23  ;;  %v266_v31 = vmul.f32 %v4226_v50, %v234_v24  ;;  %v220_v18 = vld [vmem:[#allocation12 + $0x18] sm:$0xff]  ;;  %v3895_v21 = vld [vmem:[#allocation12 + $0x60] sm:$0xff]  ;;  %s3331_s25 = sshll.u32 (%p5119_p1), %s4324_s24, 4  ;;  %s3332_s25 = int_to_ptr.vmem [resolvable:$true] %s3331_s25 }
  0xe5   : > { %v298_v34 = vmul.f32 %v4226_v50, %v218_v23  ;;  %v314_v35 = vmul.f32 %v4242_v54, %v234_v24  ;;  %1564 = vmatpush.msrb.mxu1 %v5269_v10  ;;  %1323 = vmatpush.msra.mxu3 %v5277_v0  ;;  %v251_v41 = vmul.f32 %v4246_v55, %v219_v39  ;;  %v236_v22 = vld [vmem:[#allocation12 + $0x98] sm:$0xff] }
  0xe6   : > { %v281_v32 = vsub.f32 %v249_v26, %v265_v27  ;;  %v329_v33 = vadd.f32 %v313_v29, %v297_v28  ;;  %1435 = vmatpush.msrb.mxu0 %v5274_v3  ;;  %v282_v37 = vsub.f32 %v250_v30, %v266_v31  ;;  %v267_v42 = vmul.f32 %v4230_v51, %v235_v40  ;;  %v221_v31 = vld [vmem:[#allocation12 + $0x20] sm:$0xff] }
  0xe7   : > { %v330_v38 = vadd.f32 %v314_v35, %v298_v34  ;;  %1565 = vmatpush.msrb.mxu1 %v5273_v5  ;;  %1757 = vmatpush.msrb.mxu2 %v5276_v1  ;;  %v299_v44 = vmul.f32 %v4230_v51, %v219_v39  ;;  %v315_v45 = vmul.f32 %v4246_v55, %v235_v40  ;;  %v222_v40 = vld [vmem:[#allocation12 + $0x28] sm:$0xff] }
  0xe8   : > { %v571_v36 = vadd.f32 %v329_v33, %v281_v32  ;;  %3447 = vmatmul.msk.f32.vlgmr.msra.gmra.mxu0 %vm160_vm0, %v281_v32  ;;  %3463 = vmatmul.msk.f32.vlgmr.msra.gmra.mxu1 %vm160_vm0, %v329_v33  ;;  %v283_v46 = vsub.f32 %v251_v41, %v267_v42  ;;  %v252_v23 = vmul.f32 %v4242_v54, %v220_v18  ;;  %v237_v32 = vld [vmem:[#allocation12 + $0xa0] sm:$0xff]  ;;  %v238_v41 = vld [vmem:[#allocation12 + $0xa8] sm:$0xff] }
  0xe9   : > { %1436 = vmatpush.msrb.mxu0 %v5275_v2  ;;  %1870 = vmatpush.msrb.mxu3 %v5284_v9  ;;  %v572_v43 = vadd.f32 %v330_v38, %v282_v37  ;;  %v331_v47 = vadd.f32 %v315_v45, %v299_v44  ;;  %v268_v26 = vmul.f32 %v4226_v50, %v236_v22 }
  0xea   : > { %3479 = vmatmul.msk.f32.vlgmr.msra.gmra.mxu2 %vm160_vm0, %v571_v36  ;;  %2672 = vmatpush.msra.mxu1 %v5276_v1  ;;  %v300_v27 = vmul.f32 %v4226_v50, %v220_v18  ;;  %v316_v28 = vmul.f32 %v4242_v54, %v236_v22  ;;  %v253_v33 = vmul.f32 %v4246_v55, %v221_v31  ;;  %v223_v22 = vld [vmem:[#allocation12 + $0x30] sm:$0xff] }
  0xeb   : > { %1999 = vmatpush.msra.mxu0 %v5268_v11  ;;  %1758 = vmatpush.msrb.mxu2 %v5277_v0  ;;  %v573_v24 = vadd.f32 %v331_v47, %v283_v46  ;;  %v284_v29 = vsub.f32 %v252_v23, %v268_v26  ;;  %v269_v35 = vmul.f32 %v4230_v51, %v237_v32  ;;  %v239_v23 = vld [vmem:[#allocation12 + $0xb0] sm:$0xff] }
  0xec   : > { %1871 = vmatpush.msrb.mxu3 %v5285_v4  ;;  %2673 = vmatpush.msra.mxu1 %v5277_v0  ;;  %v332_v30 = vadd.f32 %v316_v28, %v300_v27  ;;  %v301_v36 = vmul.f32 %v4230_v51, %v221_v31  ;;  %v254_v42 = vmul.f32 %v4242_v54, %v222_v40 }
  0xed   : > { %2000 = vmatpush.msra.mxu0 %v5272_v6  ;;  %2785 = vmatpush.msra.mxu2 %v5284_v9  ;;  %v270_v44 = vmul.f32 %v4226_v50, %v238_v41  ;;  %v302_v45 = vmul.f32 %v4226_v50, %v222_v40  ;;  %v271_v26 = vmul.f32 %v4230_v51, %v239_v23 }
  0xee   : > { %v574_v34 = vadd.f32 %v332_v30, %v284_v29  ;;  %v303_v27 = vmul.f32 %v4230_v51, %v223_v22  ;;  %v319_v28 = vmul.f32 %v4246_v55, %v239_v23  ;;  %v226_v23 = vld [vmem:[#allocation12 + $0x48] sm:$0xff] }
  0xef   : > { %2786 = vmatpush.msra.mxu2 %v5285_v4 }
  0xf0   : > { %3448 = vmatmul.msk.f32.gmra.mxu0 %vm160_vm0, %v282_v37  ;;  %3464 = vmatmul.msk.f32.gmra.mxu1 %vm160_vm0, %v330_v38  ;;  %v317_v37 = vmul.f32 %v4246_v55, %v237_v32  ;;  %v285_v38 = vsub.f32 %v253_v33, %v269_v35  ;;  %v335_v31 = vadd.f32 %v319_v28, %v303_v27  ;;  %v224_v32 = vld [vmem:[#allocation12 + $0x38] sm:$0xff] }
  0xf1   : > { %v240_v33 = vld [vmem:[#allocation12 + $0xb8] sm:$0xff]  ;;  %v256_v35 = vmul.f32 %v4242_v54, %v224_v32  ;;  %v258_v27 = vmul.f32 %v4234_v52, %v226_v23 }
  0xf2   : > { %3480 = vmatmul.msk.f32.gmra.mxu2 %vm160_vm0, %v572_v43  ;;  %v333_v39 = vadd.f32 %v317_v37, %v301_v36  ;;  %v272_v36 = vmul.f32 %v4226_v50, %v240_v33  ;;  %v304_v37 = vmul.f32 %v4226_v50, %v224_v32 }
  0xf4   : > { %v575_v43 = vadd.f32 %v333_v39, %v285_v38 }
  0xf8   : > { %3449 = vmatmul.msk.f32.gmra.mxu0 %vm160_vm0, %v283_v46  ;;  %3465 = vmatmul.msk.f32.gmra.mxu1 %vm160_vm0, %v331_v47  ;;  %v318_v46 = vmul.f32 %v4242_v54, %v238_v41  ;;  %v286_v47 = vsub.f32 %v254_v42, %v270_v44  ;;  %v225_v41 = vld [vmem:[#allocation12 + $0x40] sm:$0xff] }
  0xf9   : > { %v241_v42 = vld [vmem:[#allocation12 + $0xc0] sm:$0xff] }
  0xfa   : > { %3481 = vmatmul.msk.f32.gmra.mxu2 %vm160_vm0, %v573_v24  ;;  %v334_v18 = vadd.f32 %v318_v46, %v302_v45  ;;  %v255_v24 = vmul.f32 %v4246_v55, %v223_v22  ;;  %v273_v44 = vmul.f32 %v4222_v49, %v241_v42  ;;  %v305_v45 = vmul.f32 %v4222_v49, %v225_v41 }
  0xfb   : > { %v321_v46 = vmul.f32 %v4238_v53, %v241_v42  ;;  %v228_v42 = vld [vmem:[#allocation12 + $0x58] sm:$0xff] }
  0xfd   : > { %v337_v22 = vadd.f32 %v321_v46, %v305_v45  ;;  %v260_v45 = vmul.f32 %v4234_v52, %v228_v42 }
 0x100   : > { %3450 = vmatmul.msk.f32.gmra.mxu0 %vm160_vm0, %v284_v29  ;;  %3466 = vmatmul.msk.f32.gmra.mxu1 %vm160_vm0, %v332_v30  ;;  %v576_v29 = vadd.f32 %v334_v18, %v286_v47  ;;  %v287_v30 = vsub.f32 %v255_v24, %v271_v26  ;;  %v242_v24 = vld [vmem:[#allocation12 + $0xc8] sm:$0xff] }
 0x101   : > { %v274_v28 = vmul.f32 %v4218_v48, %v242_v24 }
 0x102   : > { %3482 = vmatmul.msk.f32.gmra.mxu2 %vm160_vm0, %v574_v34  ;;  %v577_v34 = vadd.f32 %v335_v31, %v287_v30 }
 0x108   : > { %3451 = vmatmul.msk.f32.gmra.mxu0 %vm160_vm0, %v285_v38  ;;  %3467 = vmatmul.msk.f32.gmra.mxu1 %vm160_vm0, %v333_v39  ;;  %v320_v38 = vmul.f32 %v4242_v54, %v240_v33  ;;  %v288_v39 = vsub.f32 %v256_v35, %v272_v36  ;;  %v227_v33 = vld [vmem:[#allocation12 + $0x50] sm:$0xff] }
 0x109   : > { %v259_v35 = vmul.f32 %v4238_v53, %v227_v33 }
 0x10a   : > { %3483 = vmatmul.msk.f32.gmra.mxu2 %vm160_vm0, %v575_v43  ;;  %v336_v40 = vadd.f32 %v320_v38, %v304_v37  ;;  %v257_v43 = vmul.f32 %v4238_v53, %v225_v41  ;;  %v307_v37 = vmul.f32 %v4222_v49, %v227_v33 }
 0x110   : > { %3452 = vmatmul.msk.f32.gmra.mxu0 %vm160_vm0, %v286_v47  ;;  %3468 = vmatmul.msk.f32.gmra.mxu1 %vm160_vm0, %v334_v18  ;;  %v578_v47 = vadd.f32 %v336_v40, %v288_v39  ;;  %v289_v18 = vsub.f32 %v257_v43, %v273_v44  ;;  %v244_v43 = vld [vmem:[#allocation12 + $0xd8] sm:$0xff] }
 0x111   : > { %v276_v46 = vmul.f32 %v4218_v48, %v244_v43 }
 0x112   : > { %3484 = vmatmul.msk.f32.gmra.mxu2 %vm160_vm0, %v576_v29  ;;  %v579_v26 = vadd.f32 %v337_v22, %v289_v18  ;;  %v306_v29 = vmul.f32 %v4218_v48, %v226_v23 }
 0x118   : > { %3453 = vmatmul.msk.f32.gmra.mxu0 %vm160_vm0, %v287_v30  ;;  %3469 = vmatmul.msk.f32.gmra.mxu1 %vm160_vm0, %v335_v31  ;;  %v322_v30 = vmul.f32 %v4234_v52, %v242_v24  ;;  %v290_v31 = vsub.f32 %v258_v27, %v274_v28  ;;  %v229_v24 = vld [vmem:[#allocation12 + $0x60] sm:$0xff] }
 0x119   : > { %v261_v27 = vmul.f32 %v4238_v53, %v229_v24 }
 0x11a   : > { %3485 = vmatmul.msk.f32.gmra.mxu2 %vm160_vm0, %v577_v34  ;;  %v338_v32 = vadd.f32 %v322_v30, %v306_v29  ;;  %v243_v34 = vld [vmem:[#allocation12 + $0xd0] sm:$0xff]  ;;  %v309_v29 = vmul.f32 %v4222_v49, %v229_v24 }
 0x11b   : > { %v275_v36 = vmul.f32 %v4222_v49, %v243_v34  ;;  %v323_v38 = vmul.f32 %v4238_v53, %v243_v34  ;;  %v230_v34 = vld [vmem:[#allocation12 + $0x68] sm:$0xff] }
 0x11d   : > { %v339_v41 = vadd.f32 %v323_v38, %v307_v37  ;;  %v262_v37 = vmul.f32 %v4234_v52, %v230_v34 }
 0x120   : > { %3454 = vmatmul.msk.f32.gmra.mxu0 %vm160_vm0, %v288_v39  ;;  %3470 = vmatmul.msk.f32.gmra.mxu1 %vm160_vm0, %v336_v40  ;;  %v580_v39 = vadd.f32 %v338_v32, %v290_v31  ;;  %v291_v40 = vsub.f32 %v259_v35, %v275_v36  ;;  %v246_v35 = vld [vmem:[#allocation12 + $0xe8] sm:$0xff] }
 0x121   : > { %v278_v38 = vmul.f32 %v4218_v48, %v246_v35 }
 0x122   : > { %3486 = vmatmul.msk.f32.gmra.mxu2 %vm160_vm0, %v578_v47  ;;  %v581_v44 = vadd.f32 %v339_v41, %v291_v40  ;;  %v308_v47 = vmul.f32 %v4218_v48, %v228_v42 }
 0x128   : > { %3455 = vmatmul.msk.f32.gmra.mxu0 %vm160_vm0, %v289_v18  ;;  %3471 = vmatmul.msk.f32.gmra.mxu1 %vm160_vm0, %v337_v22  ;;  %v324_v18 = vmul.f32 %v4234_v52, %v244_v43  ;;  %v292_v22 = vsub.f32 %v260_v45, %v276_v46  ;;  %v231_v43 = vld [vmem:[#allocation12 + $0x70] sm:$0xff] }
 0x129   : > { %v263_v45 = vmul.f32 %v4238_v53, %v231_v43 }
 0x12a   : > { %3487 = vmatmul.msk.f32.gmra.mxu2 %vm160_vm0, %v579_v26  ;;  %v340_v23 = vadd.f32 %v324_v18, %v308_v47  ;;  %v245_v26 = vld [vmem:[#allocation12 + $0xe0] sm:$0xff]  ;;  %v311_v47 = vmul.f32 %v4222_v49, %v231_v43 }
 0x12b   : > { %v277_v28 = vmul.f32 %v4222_v49, %v245_v26  ;;  %v325_v30 = vmul.f32 %v4238_v53, %v245_v26  ;;  %v232_v26 = vld [vmem:[#allocation12 + $0x78] sm:$0xff] }
 0x12d   : > { %v341_v33 = vadd.f32 %v325_v30, %v309_v29  ;;  %v264_v29 = vmul.f32 %v4234_v52, %v232_v26 }
 0x130   : > { %3456 = vmatmul.msk.f32.gmra.mxu0 %vm160_vm0, %v290_v31  ;;  %3472 = vmatmul.msk.f32.gmra.mxu1 %vm160_vm0, %v338_v32  ;;  %v582_v31 = vadd.f32 %v340_v23, %v292_v22  ;;  %v293_v32 = vsub.f32 %v261_v27, %v277_v28  ;;  %v248_v27 = vld [vmem:[#allocation12 + $0xf8] sm:$0xff] }
 0x131   : > { %v280_v30 = vmul.f32 %v4218_v48, %v248_v27 }
 0x132   : > { %3488 = vmatmul.msk.f32.gmra.mxu2 %vm160_vm0, %v580_v39  ;;  %v583_v36 = vadd.f32 %v341_v33, %v293_v32  ;;  %v310_v39 = vmul.f32 %v4218_v48, %v230_v34 }
 0x138   : > { %3457 = vmatmul.msk.f32.gmra.mxu0 %vm160_vm0, %v291_v40  ;;  %3473 = vmatmul.msk.f32.gmra.mxu1 %vm160_vm0, %v339_v41  ;;  %v326_v40 = vmul.f32 %v4234_v52, %v246_v35  ;;  %v294_v41 = vsub.f32 %v262_v37, %v278_v38 }
 0x13a   : > { %3489 = vmatmul.msk.f32.gmra.mxu2 %vm160_vm0, %v581_v44  ;;  %v342_v42 = vadd.f32 %v326_v40, %v310_v39  ;;  %v247_v44 = vld [vmem:[#allocation12 + $0xf0] sm:$0xff] }
 0x13b   : > { %v279_v46 = vmul.f32 %v4222_v49, %v247_v44  ;;  %v327_v18 = vmul.f32 %v4238_v53, %v247_v44 }
 0x13d   : > { %v343_v24 = vadd.f32 %v327_v18, %v311_v47 }
 0x140   : > { %3458 = vmatmul.msk.f32.gmra.mxu0 %vm160_vm0, %v292_v22  ;;  %3474 = vmatmul.msk.f32.gmra.mxu1 %vm160_vm0, %v340_v23  ;;  %v584_v22 = vadd.f32 %v342_v42, %v294_v41  ;;  %v295_v23 = vsub.f32 %v263_v45, %v279_v46 }
 0x142   : > { %3490 = vmatmul.msk.f32.gmra.mxu2 %vm160_vm0, %v582_v31  ;;  %v585_v28 = vadd.f32 %v343_v24, %v295_v23  ;;  %v312_v31 = vmul.f32 %v4218_v48, %v232_v26 }
 0x148   : > { %3459 = vmatmul.msk.f32.gmra.mxu0 %vm160_vm0, %v293_v32  ;;  %3475 = vmatmul.msk.f32.gmra.mxu1 %vm160_vm0, %v341_v33  ;;  %v328_v32 = vmul.f32 %v4234_v52, %v248_v27  ;;  %v296_v33 = vsub.f32 %v264_v29, %v280_v30 }
 0x14a   : > { %3491 = vmatmul.msk.f32.gmra.mxu2 %vm160_vm0, %v583_v36  ;;  %v344_v34 = vadd.f32 %v328_v32, %v312_v31 }
 0x14c   : > { %v586_v35 = vadd.f32 %v344_v34, %v296_v33 }
 0x150   : > { %3460 = vmatmul.msk.f32.gmra.mxu0 %vm160_vm0, %v294_v41  ;;  %3476 = vmatmul.msk.f32.gmra.mxu1 %vm160_vm0, %v342_v42 }
 0x152   : > { %3492 = vmatmul.msk.f32.gmra.mxu2 %vm160_vm0, %v584_v22 }
 0x158   : > { %3461 = vmatmul.msk.f32.gmra.mxu0 %vm160_vm0, %v295_v23  ;;  %3477 = vmatmul.msk.f32.gmra.mxu1 %vm160_vm0, %v343_v24 }
 0x15a   : > { %3493 = vmatmul.msk.f32.gmra.mxu2 %vm160_vm0, %v585_v28 }
 0x160   : > { %3462 = vmatmul.msk.f32.gmra.mxu0 %vm160_vm0, %v296_v33  ;;  %3478 = vmatmul.msk.f32.gmra.mxu1 %vm160_vm0, %v344_v34 }
 0x162   : > { %3494 = vmatmul.msk.f32.gmra.mxu2 %vm160_vm0, %v586_v35 }
 0x165   : > { %v410_v36 = vpop.f32.mrf.mxu0  ;;  %v523_v37 = vpop.f32.mrf.mxu1 }
 0x166   : > { %v700_v38 = vsub.f32 %v410_v36, %v523_v37 }
 0x168   : > { %748 = vxpose.xlu0.b32.start [1/2] (short) (narrow) %v700_v38, 16 }
 0x16d   : > { %v652_v39 = vpop.f32.mrf.mxu2  ;;  %v413_v40 = vpop.f32.mrf.mxu0 }
 0x16e   : > { %v716_v41 = vsub.f32 %v652_v39, %v410_v36  ;;  %v526_v42 = vpop.f32.mrf.mxu1 }
 0x16f   : > { %v701_v43 = vsub.f32 %v413_v40, %v526_v42 }
 0x170   : > { %v732_v44 = vsub.f32 %v716_v41, %v523_v37 }
 0x171   : > { %749 = vxpose.xlu0.b32.end [2/2] (short) (narrow) %v701_v43, 16 }
 0x172   : > { %1004 = vxpose.xlu1.b32.start [1/2] (short) (narrow) %v732_v44, 16 }
 0x175   : > { %v655_v45 = vpop.f32.mrf.mxu2  ;;  %v416_v46 = vpop.f32.mrf.mxu0 }
 0x176   : > { %v717_v47 = vsub.f32 %v655_v45, %v413_v40  ;;  %v529_v18 = vpop.f32.mrf.mxu1 }
 0x177   : > { %v702_v22 = vsub.f32 %v416_v46, %v529_v18 }
 0x178   : > { %v733_v23 = vsub.f32 %v717_v47, %v526_v42 }
 0x179   : > { %780 = vxpose.xlu2.b32.start [1/2] (short) (narrow) %v702_v22, 16 }
 0x17a   : > { %1005 = vxpose.xlu1.b32.end [2/2] (short) (narrow) %v733_v23, 16 }
 0x17d   : > { %v658_v24 = vpop.f32.mrf.mxu2  ;;  %v419_v26 = vpop.f32.mrf.mxu0 }
 0x17e   : > { %v718_v27 = vsub.f32 %v658_v24, %v416_v46  ;;  %v532_v28 = vpop.f32.mrf.mxu1 }
 0x17f   : > { %v703_v29 = vsub.f32 %v419_v26, %v532_v28 }
 0x180   : > { %v734_v30 = vsub.f32 %v718_v27, %v529_v18 }
 0x181   : > { %781 = vxpose.xlu2.b32.end [2/2] (short) (narrow) %v703_v29, 16 }
 0x182   : > { %1036 = vxpose.xlu0.b32.start [1/2] (short) (narrow) %v734_v30, 16 }
 0x185   : > { %v661_v31 = vpop.f32.mrf.mxu2  ;;  %v422_v32 = vpop.f32.mrf.mxu0 }
 0x186   : > { %v719_v33 = vsub.f32 %v661_v31, %v419_v26  ;;  %v535_v34 = vpop.f32.mrf.mxu1 }
 0x187   : > { %v704_v35 = vsub.f32 %v422_v32, %v535_v34 }
 0x188   : > { %v735_v36 = vsub.f32 %v719_v33, %v532_v28 }
 0x189   : > { %812 = vxpose.xlu1.b32.start [1/2] (short) (narrow) %v704_v35, 16 }
 0x18a   : > { %1037 = vxpose.xlu0.b32.end [2/2] (short) (narrow) %v735_v36, 16 }
 0x18d   : > { %v664_v37 = vpop.f32.mrf.mxu2  ;;  %v425_v38 = vpop.f32.mrf.mxu0 }
 0x18e   : > { %v720_v39 = vsub.f32 %v664_v37, %v422_v32  ;;  %v538_v40 = vpop.f32.mrf.mxu1 }
 0x18f   : > { %v705_v41 = vsub.f32 %v425_v38, %v538_v40 }
 0x190   : > { %v736_v42 = vsub.f32 %v720_v39, %v535_v34 }
 0x191   : > { %813 = vxpose.xlu1.b32.end [2/2] (short) (narrow) %v705_v41, 16 }
 0x192   : > { %1068 = vxpose.xlu2.b32.start [1/2] (short) (narrow) %v736_v42, 16 }
 0x195   : > { %v667_v43 = vpop.f32.mrf.mxu2  ;;  %v428_v44 = vpop.f32.mrf.mxu0 }
 0x196   : > { %v721_v45 = vsub.f32 %v667_v43, %v425_v38  ;;  %v541_v46 = vpop.f32.mrf.mxu1 }
 0x197   : > { %v706_v47 = vsub.f32 %v428_v44, %v541_v46 }
 0x198   : > { %v737_v18 = vsub.f32 %v721_v45, %v538_v40 }
 0x199   : > { %844 = vxpose.xlu0.b32.start [1/2] (short) (narrow) %v706_v47, 16 }
 0x19a   : > { %1069 = vxpose.xlu2.b32.end [2/2] (short) (narrow) %v737_v18, 16 }
 0x19d   : > { %v670_v22 = vpop.f32.mrf.mxu2  ;;  %v431_v23 = vpop.f32.mrf.mxu0 }
 0x19e   : > { %v722_v24 = vsub.f32 %v670_v22, %v428_v44  ;;  %v544_v26 = vpop.f32.mrf.mxu1 }
 0x19f   : > { %v707_v27 = vsub.f32 %v431_v23, %v544_v26 }
 0x1a0   : > { %v738_v28 = vsub.f32 %v722_v24, %v541_v46 }
 0x1a1   : > { %845 = vxpose.xlu0.b32.end [2/2] (short) (narrow) %v707_v27, 16 }
 0x1a2   : > { %1100 = vxpose.xlu1.b32.start [1/2] (short) (narrow) %v738_v28, 16 }
 0x1a5   : > { %v673_v29 = vpop.f32.mrf.mxu2  ;;  %v434_v30 = vpop.f32.mrf.mxu0 }
 0x1a6   : > { %v723_v31 = vsub.f32 %v673_v29, %v431_v23  ;;  %v547_v32 = vpop.f32.mrf.mxu1 }
 0x1a7   : > { %v708_v33 = vsub.f32 %v434_v30, %v547_v32 }
 0x1a8   : > { %v739_v34 = vsub.f32 %v723_v31, %v544_v26 }
 0x1a9   : > { %876 = vxpose.xlu2.b32.start [1/2] (short) (narrow) %v708_v33, 16 }
 0x1aa   : > { %1101 = vxpose.xlu1.b32.end [2/2] (short) (narrow) %v739_v34, 16 }
 0x1ad   : > { %v676_v35 = vpop.f32.mrf.mxu2  ;;  %v437_v36 = vpop.f32.mrf.mxu0 }
 0x1ae   : > { %v724_v37 = vsub.f32 %v676_v35, %v434_v30  ;;  %v550_v38 = vpop.f32.mrf.mxu1 }
 0x1af   : > { %v709_v39 = vsub.f32 %v437_v36, %v550_v38 }
 0x1b0   : > { %v740_v40 = vsub.f32 %v724_v37, %v547_v32 }
 0x1b1   : > { %877 = vxpose.xlu2.b32.end [2/2] (short) (narrow) %v709_v39, 16 }
 0x1b2   : > { %1132 = vxpose.xlu0.b32.start [1/2] (short) (narrow) %v740_v40, 16 }
 0x1b5   : > { %v679_v41 = vpop.f32.mrf.mxu2  ;;  %v440_v42 = vpop.f32.mrf.mxu0 }
 0x1b6   : > { %v725_v43 = vsub.f32 %v679_v41, %v437_v36  ;;  %v553_v44 = vpop.f32.mrf.mxu1 }
 0x1b7   : > { %v710_v45 = vsub.f32 %v440_v42, %v553_v44 }
 0x1b8   : > { %v741_v46 = vsub.f32 %v725_v43, %v550_v38 }
 0x1b9   : > { %908 = vxpose.xlu1.b32.start [1/2] (short) (narrow) %v710_v45, 16 }
 0x1ba   : > { %1133 = vxpose.xlu0.b32.end [2/2] (short) (narrow) %v741_v46, 16 }
 0x1bd   : > { %v682_v47 = vpop.f32.mrf.mxu2  ;;  %v443_v18 = vpop.f32.mrf.mxu0 }
 0x1be   : > { %v726_v22 = vsub.f32 %v682_v47, %v440_v42  ;;  %v556_v23 = vpop.f32.mrf.mxu1 }
 0x1bf   : > { %v711_v24 = vsub.f32 %v443_v18, %v556_v23 }
 0x1c0   : > { %v742_v26 = vsub.f32 %v726_v22, %v553_v44 }
 0x1c1   : > { %909 = vxpose.xlu1.b32.end [2/2] (short) (narrow) %v711_v24, 16 }
 0x1c2   : > { %1164 = vxpose.xlu2.b32.start [1/2] (short) (narrow) %v742_v26, 16 }
 0x1c5   : > { %v685_v27 = vpop.f32.mrf.mxu2  ;;  %v446_v28 = vpop.f32.mrf.mxu0 }
 0x1c6   : > { %v727_v29 = vsub.f32 %v685_v27, %v443_v18  ;;  %v559_v30 = vpop.f32.mrf.mxu1 }
 0x1c7   : > { %v712_v31 = vsub.f32 %v446_v28, %v559_v30 }
 0x1c8   : > { %v743_v32 = vsub.f32 %v727_v29, %v556_v23 }
 0x1c9   : > { %940 = vxpose.xlu0.b32.start [1/2] (short) (narrow) %v712_v31, 16 }
 0x1ca   : > { %1165 = vxpose.xlu2.b32.end [2/2] (short) (narrow) %v743_v32, 16 }
 0x1cd   : > { %v688_v33 = vpop.f32.mrf.mxu2  ;;  %v449_v34 = vpop.f32.mrf.mxu0 }
 0x1ce   : > { %v728_v35 = vsub.f32 %v688_v33, %v446_v28  ;;  %v562_v36 = vpop.f32.mrf.mxu1 }
 0x1cf   : > { %v713_v37 = vsub.f32 %v449_v34, %v562_v36 }
 0x1d0   : > { %v744_v38 = vsub.f32 %v728_v35, %v559_v30 }
 0x1d1   : > { %941 = vxpose.xlu0.b32.end [2/2] (short) (narrow) %v713_v37, 16 }
 0x1d2   : > { %1196 = vxpose.xlu1.b32.start [1/2] (short) (narrow) %v744_v38, 16 }
 0x1d5   : > { %v691_v39 = vpop.f32.mrf.mxu2  ;;  %v452_v40 = vpop.f32.mrf.mxu0 }
 0x1d6   : > { %v729_v41 = vsub.f32 %v691_v39, %v449_v34  ;;  %v565_v42 = vpop.f32.mrf.mxu1 }
 0x1d7   : > { %v714_v43 = vsub.f32 %v452_v40, %v565_v42 }
 0x1d8   : > { %v745_v44 = vsub.f32 %v729_v41, %v562_v36 }
 0x1d9   : > { %972 = vxpose.xlu2.b32.start [1/2] (short) (narrow) %v714_v43, 16 }
 0x1da   : > { %1197 = vxpose.xlu1.b32.end [2/2] (short) (narrow) %v745_v44, 16 }
 0x1dd   : > { %v694_v45 = vpop.f32.mrf.mxu2  ;;  %v455_v46 = vpop.f32.mrf.mxu0 }
 0x1de   : > { %v730_v47 = vsub.f32 %v694_v45, %v452_v40  ;;  %v568_v18 = vpop.f32.mrf.mxu1 }
 0x1df   : > { %v715_v22 = vsub.f32 %v455_v46, %v568_v18 }
 0x1e0   : > { %v746_v23 = vsub.f32 %v730_v47, %v565_v42 }
 0x1e1   : > { %973 = vxpose.xlu2.b32.end [2/2] (short) (narrow) %v715_v22, 16 }
 0x1e2   : > { %1228 = vxpose.xlu0.b32.start [1/2] (short) (narrow) %v746_v23, 16 }
 0x1e5   : > { %v697_v24 = vpop.f32.mrf.mxu2 }
 0x1e6   : > { %v731_v26 = vsub.f32 %v697_v24, %v455_v46 }
 0x1e8   : > { %v747_v27 = vsub.f32 %v731_v26, %v568_v18 }
 0x1ea   : > { %1229 = vxpose.xlu0.b32.end [2/2] (short) (narrow) %v747_v27, 16 }
 0x20d   : > { %v764_v28 = vpop.trf.xlu0 }
 0x20e   : > { %3495 = vmatmul.msk.f32.vlgmr.msra.gmra.mxu3 %vm160_vm0, %v764_v28 }
 0x20f   : > { %2914 = vmatpush.msra.mxu3 %v5268_v11 }
 0x211   : > { %2915 = vmatpush.msra.mxu3 %v5272_v6 }
 0x212   : > { %v796_v32 = vpop.trf.xlu2 }
 0x215   : > { %v765_v29 = vpop.trf.xlu0 }
 0x216   : > { %v1020_v30 = vpop.trf.xlu1  ;;  %3496 = vmatmul.msk.f32.gmra.mxu3 %vm160_vm0, %v765_v29 }
 0x217   : > { %v1486_v31 = vadd.f32 %v1020_v30, %v764_v28  ;;  %3511 = vmatmul.msk.f32.vlgmr.msrb.gmra.mxu0 %vm160_vm0, %v1020_v30 }
 0x219   : > { %3527 = vmatmul.msk.f32.vlgmr.msrb.gmra.mxu1 %vm160_vm0, %v1486_v31 }
 0x21a   : > { %v797_v35 = vpop.trf.xlu2 }
 0x21e   : > { %v1021_v33 = vpop.trf.xlu1  ;;  %3497 = vmatmul.msk.f32.gmra.mxu3 %vm160_vm0, %v796_v32 }
 0x21f   : > { %3512 = vmatmul.msk.f32.gmra.mxu0 %vm160_vm0, %v1021_v33  ;;  %v1487_v34 = vadd.f32 %v1021_v33, %v765_v29 }
 0x221   : > { %3528 = vmatmul.msk.f32.gmra.mxu1 %vm160_vm0, %v1487_v34 }
 0x226   : > { %v1052_v36 = vpop.trf.xlu0  ;;  %3498 = vmatmul.msk.f32.gmra.mxu3 %vm160_vm0, %v797_v35 }
 0x227   : > { %3513 = vmatmul.msk.f32.gmra.mxu0 %vm160_vm0, %v1052_v36  ;;  %v1488_v37 = vadd.f32 %v1052_v36, %v796_v32 }
 0x229   : > { %3529 = vmatmul.msk.f32.gmra.mxu1 %vm160_vm0, %v1488_v37 }
 0x22b   : > { %v1084_v41 = vpop.trf.xlu2 }
 0x22d   : > { %v828_v38 = vpop.trf.xlu1 }
 0x22e   : > { %v1053_v39 = vpop.trf.xlu0  ;;  %3499 = vmatmul.msk.f32.gmra.mxu3 %vm160_vm0, %v828_v38  ;;  %v1490_v43 = vadd.f32 %v1084_v41, %v828_v38 }
 0x22f   : > { %3514 = vmatmul.msk.f32.gmra.mxu0 %vm160_vm0, %v1053_v39  ;;  %v1489_v40 = vadd.f32 %v1053_v39, %v797_v35 }
 0x231   : > { %3530 = vmatmul.msk.f32.gmra.mxu1 %vm160_vm0, %v1489_v40 }
 0x233   : > { %v1085_v44 = vpop.trf.xlu2 }
 0x235   : > { %v829_v42 = vpop.trf.xlu1 }
 0x236   : > { %3500 = vmatmul.msk.f32.gmra.mxu3 %vm160_vm0, %v829_v42  ;;  %v1491_v46 = vadd.f32 %v1085_v44, %v829_v42 }
 0x237   : > { %3515 = vmatmul.msk.f32.gmra.mxu0 %vm160_vm0, %v1084_v41 }
 0x239   : > { %3531 = vmatmul.msk.f32.gmra.mxu1 %vm160_vm0, %v1490_v43 }
 0x23d   : > { %v860_v45 = vpop.trf.xlu0 }
 0x23e   : > { %3501 = vmatmul.msk.f32.gmra.mxu3 %vm160_vm0, %v860_v45 }
 0x23f   : > { %3516 = vmatmul.msk.f32.gmra.mxu0 %vm160_vm0, %v1085_v44 }
 0x241   : > { %3532 = vmatmul.msk.f32.gmra.mxu1 %vm160_vm0, %v1491_v46 }
 0x242   : > { %v892_v23 = vpop.trf.xlu2 }
 0x245   : > { %v861_v47 = vpop.trf.xlu0 }
 0x246   : > { %v1116_v18 = vpop.trf.xlu1  ;;  %3502 = vmatmul.msk.f32.gmra.mxu3 %vm160_vm0, %v861_v47 }
 0x247   : > { %3517 = vmatmul.msk.f32.gmra.mxu0 %vm160_vm0, %v1116_v18  ;;  %v1492_v22 = vadd.f32 %v1116_v18, %v860_v45 }
 0x249   : > { %3533 = vmatmul.msk.f32.gmra.mxu1 %vm160_vm0, %v1492_v22 }
 0x24a   : > { %v893_v27 = vpop.trf.xlu2 }
 0x24e   : > { %v1117_v24 = vpop.trf.xlu1  ;;  %3503 = vmatmul.msk.f32.gmra.mxu3 %vm160_vm0, %v892_v23 }
 0x24f   : > { %3518 = vmatmul.msk.f32.gmra.mxu0 %vm160_vm0, %v1117_v24  ;;  %v1493_v26 = vadd.f32 %v1117_v24, %v861_v47 }
 0x251   : > { %3534 = vmatmul.msk.f32.gmra.mxu1 %vm160_vm0, %v1493_v26 }
 0x256   : > { %v1148_v28 = vpop.trf.xlu0  ;;  %3504 = vmatmul.msk.f32.gmra.mxu3 %vm160_vm0, %v893_v27 }
 0x257   : > { %v1494_v29 = vadd.f32 %v1148_v28, %v892_v23  ;;  %3519 = vmatmul.msk.f32.gmra.mxu0 %vm160_vm0, %v1148_v28 }
 0x259   : > { %3535 = vmatmul.msk.f32.gmra.mxu1 %vm160_vm0, %v1494_v29 }
 0x25b   : > { %v1180_v33 = vpop.trf.xlu2 }
 0x25d   : > { %v924_v30 = vpop.trf.xlu1 }
 0x25e   : > { %v1149_v31 = vpop.trf.xlu0  ;;  %3505 = vmatmul.msk.f32.gmra.mxu3 %vm160_vm0, %v924_v30  ;;  %v1496_v35 = vadd.f32 %v1180_v33, %v924_v30 }
 0x25f   : > { %v1495_v32 = vadd.f32 %v1149_v31, %v893_v27  ;;  %3520 = vmatmul.msk.f32.gmra.mxu0 %vm160_vm0, %v1149_v31 }
 0x261   : > { %3536 = vmatmul.msk.f32.gmra.mxu1 %vm160_vm0, %v1495_v32 }
 0x263   : > { %v1181_v36 = vpop.trf.xlu2 }
 0x265   : > { %v925_v34 = vpop.trf.xlu1 }
 0x266   : > { %3506 = vmatmul.msk.f32.gmra.mxu3 %vm160_vm0, %v925_v34  ;;  %v1497_v38 = vadd.f32 %v1181_v36, %v925_v34 }
 0x267   : > { %3521 = vmatmul.msk.f32.gmra.mxu0 %vm160_vm0, %v1180_v33 }
 0x269   : > { %3537 = vmatmul.msk.f32.gmra.mxu1 %vm160_vm0, %v1496_v35 }
 0x26d   : > { %v956_v37 = vpop.trf.xlu0 }
 0x26e   : > { %3507 = vmatmul.msk.f32.gmra.mxu3 %vm160_vm0, %v956_v37 }
 0x26f   : > { %3522 = vmatmul.msk.f32.gmra.mxu0 %vm160_vm0, %v1181_v36 }
 0x271   : > { %3538 = vmatmul.msk.f32.gmra.mxu1 %vm160_vm0, %v1497_v38 }
 0x272   : > { %v988_v42 = vpop.trf.xlu2 }
 0x275   : > { %v957_v39 = vpop.trf.xlu0 }
 0x276   : > { %v1212_v40 = vpop.trf.xlu1  ;;  %3508 = vmatmul.msk.f32.gmra.mxu3 %vm160_vm0, %v957_v39 }
 0x277   : > { %v1498_v41 = vadd.f32 %v1212_v40, %v956_v37  ;;  %3523 = vmatmul.msk.f32.gmra.mxu0 %vm160_vm0, %v1212_v40 }
 0x279   : > { %3539 = vmatmul.msk.f32.gmra.mxu1 %vm160_vm0, %v1498_v41 }
 0x27a   : > { %v989_v45 = vpop.trf.xlu2 }
 0x27e   : > { %v1213_v43 = vpop.trf.xlu1  ;;  %3509 = vmatmul.msk.f32.gmra.mxu3 %vm160_vm0, %v988_v42 }
 0x27f   : > { %v1499_v44 = vadd.f32 %v1213_v43, %v957_v39  ;;  %3524 = vmatmul.msk.f32.gmra.mxu0 %vm160_vm0, %v1213_v43 }
 0x281   : > { %3540 = vmatmul.msk.f32.gmra.mxu1 %vm160_vm0, %v1499_v44 }
 0x286   : > { %v1244_v46 = vpop.trf.xlu0  ;;  %3510 = vmatmul.msk.f32.gmra.mxu3 %vm160_vm0, %v989_v45 }
 0x287   : > { %v1500_v47 = vadd.f32 %v1244_v46, %v988_v42  ;;  %3525 = vmatmul.msk.f32.gmra.mxu0 %vm160_vm0, %v1244_v46 }
 0x289   : > { %3541 = vmatmul.msk.f32.gmra.mxu1 %vm160_vm0, %v1500_v47 }
 0x28e   : > { %v1245_v18 = vpop.trf.xlu0 }
 0x28f   : > { %v1501_v22 = vadd.f32 %v1245_v18, %v989_v45  ;;  %3526 = vmatmul.msk.f32.gmra.mxu0 %vm160_vm0, %v1245_v18 }
 0x291   : > { %3542 = vmatmul.msk.f32.gmra.mxu1 %vm160_vm0, %v1501_v22  ;;  %v1325_v23 = vpop.f32.mrf.mxu3 }
 0x294   : > { %v1438_v24 = vpop.f32.mrf.mxu0 }
 0x295   : > { %v1615_v26 = vsub.f32 %v1325_v23, %v1438_v24 }
 0x296   : > { %v1567_v27 = vpop.f32.mrf.mxu1 }
 0x297   : > { %v1631_v28 = vsub.f32 %v1567_v27, %v1325_v23  ;;  %v1663_v29 = vmul.f32 %v1615_v26, %v5271_v7 }
 0x299   : > { %v1647_v30 = vsub.f32 %v1631_v28, %v1438_v24  ;;  %3543 = vmatmul.msk.f32.vlgmr.msrb.gmra.mxu2 %vm160_vm0, %v1663_v29  ;;  %v1328_v31 = vpop.f32.mrf.mxu3 }
 0x29b   : > { %v1679_v32 = vmul.f32 %v1647_v30, %v5271_v7 }
 0x29c   : > { %v1441_v33 = vpop.f32.mrf.mxu0 }
 0x29d   : > { %3559 = vmatmul.msk.f32.vlgmr.msrb.gmra.mxu3 %vm160_vm0, %v1679_v32  ;;  %v1921_v34 = vadd.f32 %v1679_v32, %v1663_v29  ;;  %v1616_v35 = vsub.f32 %v1328_v31, %v1441_v33 }
 0x29e   : > { %v1570_v36 = vpop.f32.mrf.mxu1 }
 0x29f   : > { %v1632_v37 = vsub.f32 %v1570_v36, %v1328_v31  ;;  %3575 = vmatmul.msk.f32.vlgmr.msra.gmra.mxu0 %vm160_vm0, %v1921_v34  ;;  %v1664_v38 = vmul.f32 %v1616_v35, %v5270_v8 }
 0x2a1   : > { %3544 = vmatmul.msk.f32.gmra.mxu2 %vm160_vm0, %v1664_v38  ;;  %v1331_v39 = vpop.f32.mrf.mxu3  ;;  %v1648_v40 = vsub.f32 %v1632_v37, %v1441_v33 }
 0x2a3   : > { %v1680_v41 = vmul.f32 %v1648_v40, %v5270_v8 }
 0x2a4   : > { %v1444_v42 = vpop.f32.mrf.mxu0 }
 0x2a5   : > { %3560 = vmatmul.msk.f32.gmra.mxu3 %vm160_vm0, %v1680_v41  ;;  %v1922_v43 = vadd.f32 %v1680_v41, %v1664_v38  ;;  %v1617_v44 = vsub.f32 %v1331_v39, %v1444_v42 }
 0x2a6   : > { %v1573_v45 = vpop.f32.mrf.mxu1 }
 0x2a7   : > { %v1633_v46 = vsub.f32 %v1573_v45, %v1331_v39  ;;  %3576 = vmatmul.msk.f32.gmra.mxu0 %vm160_vm0, %v1922_v43  ;;  %v1665_v47 = vmul.f32 %v1617_v44, %v5271_v7 }
 0x2a9   : > { %3545 = vmatmul.msk.f32.gmra.mxu2 %vm160_vm0, %v1665_v47  ;;  %v1334_v18 = vpop.f32.mrf.mxu3  ;;  %v1649_v22 = vsub.f32 %v1633_v46, %v1444_v42 }
 0x2ab   : > { %v1681_v23 = vmul.f32 %v1649_v22, %v5271_v7 }
 0x2ac   : > { %v1447_v24 = vpop.f32.mrf.mxu0 }
 0x2ad   : > { %3561 = vmatmul.msk.f32.gmra.mxu3 %vm160_vm0, %v1681_v23  ;;  %v1923_v26 = vadd.f32 %v1681_v23, %v1665_v47  ;;  %v1618_v27 = vsub.f32 %v1334_v18, %v1447_v24 }
 0x2ae   : > { %v1576_v28 = vpop.f32.mrf.mxu1 }
 0x2af   : > { %v1634_v29 = vsub.f32 %v1576_v28, %v1334_v18  ;;  %3577 = vmatmul.msk.f32.gmra.mxu0 %vm160_vm0, %v1923_v26  ;;  %v1666_v30 = vmul.f32 %v1618_v27, %v5270_v8 }
 0x2b1   : > { %3546 = vmatmul.msk.f32.gmra.mxu2 %vm160_vm0, %v1666_v30  ;;  %v1337_v31 = vpop.f32.mrf.mxu3  ;;  %v1650_v32 = vsub.f32 %v1634_v29, %v1447_v24 }
 0x2b3   : > { %v1682_v33 = vmul.f32 %v1650_v32, %v5270_v8 }
 0x2b4   : > { %v1450_v34 = vpop.f32.mrf.mxu0 }
 0x2b5   : > { %3562 = vmatmul.msk.f32.gmra.mxu3 %vm160_vm0, %v1682_v33  ;;  %v1924_v35 = vadd.f32 %v1682_v33, %v1666_v30  ;;  %v1619_v36 = vsub.f32 %v1337_v31, %v1450_v34 }
 0x2b6   : > { %v1579_v37 = vpop.f32.mrf.mxu1 }
 0x2b7   : > { %v1635_v38 = vsub.f32 %v1579_v37, %v1337_v31  ;;  %3578 = vmatmul.msk.f32.gmra.mxu0 %vm160_vm0, %v1924_v35  ;;  %v1667_v39 = vmul.f32 %v1619_v36, %v5271_v7 }
 0x2b9   : > { %3547 = vmatmul.msk.f32.gmra.mxu2 %vm160_vm0, %v1667_v39  ;;  %v1340_v40 = vpop.f32.mrf.mxu3  ;;  %v1651_v41 = vsub.f32 %v1635_v38, %v1450_v34 }
 0x2bb   : > { %v1683_v42 = vmul.f32 %v1651_v41, %v5271_v7 }
 0x2bc   : > { %v1453_v43 = vpop.f32.mrf.mxu0 }
 0x2bd   : > { %3563 = vmatmul.msk.f32.gmra.mxu3 %vm160_vm0, %v1683_v42  ;;  %v1925_v44 = vadd.f32 %v1683_v42, %v1667_v39  ;;  %v1620_v45 = vsub.f32 %v1340_v40, %v1453_v43 }
 0x2be   : > { %v1582_v46 = vpop.f32.mrf.mxu1 }
 0x2bf   : > { %v1636_v47 = vsub.f32 %v1582_v46, %v1340_v40  ;;  %3579 = vmatmul.msk.f32.gmra.mxu0 %vm160_vm0, %v1925_v44  ;;  %v1668_v18 = vmul.f32 %v1620_v45, %v5270_v8 }
 0x2c1   : > { %3548 = vmatmul.msk.f32.gmra.mxu2 %vm160_vm0, %v1668_v18  ;;  %v1343_v22 = vpop.f32.mrf.mxu3  ;;  %v1652_v23 = vsub.f32 %v1636_v47, %v1453_v43 }
 0x2c3   : > { %v1684_v24 = vmul.f32 %v1652_v23, %v5270_v8 }
 0x2c4   : > { %v1456_v26 = vpop.f32.mrf.mxu0 }
 0x2c5   : > { %3564 = vmatmul.msk.f32.gmra.mxu3 %vm160_vm0, %v1684_v24  ;;  %v1926_v27 = vadd.f32 %v1684_v24, %v1668_v18  ;;  %v1621_v28 = vsub.f32 %v1343_v22, %v1456_v26 }
 0x2c6   : > { %v1585_v29 = vpop.f32.mrf.mxu1 }
 0x2c7   : > { %v1637_v30 = vsub.f32 %v1585_v29, %v1343_v22  ;;  %3580 = vmatmul.msk.f32.gmra.mxu0 %vm160_vm0, %v1926_v27  ;;  %v1669_v31 = vmul.f32 %v1621_v28, %v5271_v7 }
 0x2c9   : > { %3549 = vmatmul.msk.f32.gmra.mxu2 %vm160_vm0, %v1669_v31  ;;  %v1346_v32 = vpop.f32.mrf.mxu3  ;;  %v1653_v33 = vsub.f32 %v1637_v30, %v1456_v26 }
 0x2cb   : > { %v1685_v34 = vmul.f32 %v1653_v33, %v5271_v7 }
 0x2cc   : > { %v1459_v35 = vpop.f32.mrf.mxu0 }
 0x2cd   : > { %3565 = vmatmul.msk.f32.gmra.mxu3 %vm160_vm0, %v1685_v34  ;;  %v1927_v36 = vadd.f32 %v1685_v34, %v1669_v31  ;;  %v1622_v37 = vsub.f32 %v1346_v32, %v1459_v35 }
 0x2ce   : > { %v1588_v38 = vpop.f32.mrf.mxu1 }
 0x2cf   : > { %v1638_v39 = vsub.f32 %v1588_v38, %v1346_v32  ;;  %3581 = vmatmul.msk.f32.gmra.mxu0 %vm160_vm0, %v1927_v36  ;;  %v1670_v40 = vmul.f32 %v1622_v37, %v5270_v8 }
 0x2d1   : > { %3550 = vmatmul.msk.f32.gmra.mxu2 %vm160_vm0, %v1670_v40  ;;  %v1349_v41 = vpop.f32.mrf.mxu3  ;;  %v1654_v42 = vsub.f32 %v1638_v39, %v1459_v35 }
 0x2d3   : > { %v1686_v43 = vmul.f32 %v1654_v42, %v5270_v8 }
 0x2d4   : > { %v1462_v44 = vpop.f32.mrf.mxu0 }
 0x2d5   : > { %v1623_v45 = vsub.f32 %v1349_v41, %v1462_v44  ;;  %3566 = vmatmul.msk.f32.gmra.mxu3 %vm160_vm0, %v1686_v43  ;;  %v1928_v46 = vadd.f32 %v1686_v43, %v1670_v40 }
 0x2d6   : > { %v1591_v47 = vpop.f32.mrf.mxu1 }
 0x2d7   : > { %v1671_v18 = vmul.f32 %v1623_v45, %v5267_v12  ;;  %v1639_v22 = vsub.f32 %v1591_v47, %v1349_v41  ;;  %3582 = vmatmul.msk.f32.gmra.mxu0 %vm160_vm0, %v1928_v46 }
 0x2d9   : > { %v1655_v23 = vsub.f32 %v1639_v22, %v1462_v44  ;;  %3551 = vmatmul.msk.f32.gmra.mxu2 %vm160_vm0, %v1671_v18  ;;  %v1352_v24 = vpop.f32.mrf.mxu3 }
 0x2db   : > { %v1687_v26 = vmul.f32 %v1655_v23, %v5267_v12 }
 0x2dc   : > { %v1465_v27 = vpop.f32.mrf.mxu0 }
 0x2dd   : > { %v1624_v28 = vsub.f32 %v1352_v24, %v1465_v27  ;;  %3567 = vmatmul.msk.f32.gmra.mxu3 %vm160_vm0, %v1687_v26  ;;  %v1929_v29 = vadd.f32 %v1687_v26, %v1671_v18 }
 0x2de   : > { %v1594_v30 = vpop.f32.mrf.mxu1 }
 0x2df   : > { %v1672_v31 = vmul.f32 %v1624_v28, %v5266_v13  ;;  %v1640_v32 = vsub.f32 %v1594_v30, %v1352_v24  ;;  %3583 = vmatmul.msk.f32.gmra.mxu0 %vm160_vm0, %v1929_v29 }
 0x2e1   : > { %v1656_v33 = vsub.f32 %v1640_v32, %v1465_v27  ;;  %3552 = vmatmul.msk.f32.gmra.mxu2 %vm160_vm0, %v1672_v31  ;;  %v1355_v34 = vpop.f32.mrf.mxu3 }
 0x2e3   : > { %v1688_v35 = vmul.f32 %v1656_v33, %v5266_v13 }
 0x2e4   : > { %v1468_v36 = vpop.f32.mrf.mxu0 }
 0x2e5   : > { %v1625_v37 = vsub.f32 %v1355_v34, %v1468_v36  ;;  %3568 = vmatmul.msk.f32.gmra.mxu3 %vm160_vm0, %v1688_v35  ;;  %v1930_v38 = vadd.f32 %v1688_v35, %v1672_v31 }
 0x2e6   : > { %v1597_v39 = vpop.f32.mrf.mxu1 }
 0x2e7   : > { %v1673_v40 = vmul.f32 %v1625_v37, %v5267_v12  ;;  %v1641_v41 = vsub.f32 %v1597_v39, %v1355_v34  ;;  %3584 = vmatmul.msk.f32.gmra.mxu0 %vm160_vm0, %v1930_v38 }
 0x2e9   : > { %v1657_v42 = vsub.f32 %v1641_v41, %v1468_v36  ;;  %3553 = vmatmul.msk.f32.gmra.mxu2 %vm160_vm0, %v1673_v40  ;;  %v1358_v43 = vpop.f32.mrf.mxu3 }
 0x2eb   : > { %v1689_v44 = vmul.f32 %v1657_v42, %v5267_v12 }
 0x2ec   : > { %v1471_v45 = vpop.f32.mrf.mxu0 }
 0x2ed   : > { %v1626_v46 = vsub.f32 %v1358_v43, %v1471_v45  ;;  %3569 = vmatmul.msk.f32.gmra.mxu3 %vm160_vm0, %v1689_v44  ;;  %v1931_v47 = vadd.f32 %v1689_v44, %v1673_v40 }
 0x2ee   : > { %v1600_v18 = vpop.f32.mrf.mxu1 }
 0x2ef   : > { %v1674_v22 = vmul.f32 %v1626_v46, %v5266_v13  ;;  %v1642_v23 = vsub.f32 %v1600_v18, %v1358_v43  ;;  %3585 = vmatmul.msk.f32.gmra.mxu0 %vm160_vm0, %v1931_v47 }
 0x2f1   : > { %v1658_v24 = vsub.f32 %v1642_v23, %v1471_v45  ;;  %3554 = vmatmul.msk.f32.gmra.mxu2 %vm160_vm0, %v1674_v22  ;;  %v1361_v26 = vpop.f32.mrf.mxu3 }
 0x2f3   : > { %v1690_v27 = vmul.f32 %v1658_v24, %v5266_v13 }
 0x2f4   : > { %v1474_v28 = vpop.f32.mrf.mxu0 }
 0x2f5   : > { %v1627_v29 = vsub.f32 %v1361_v26, %v1474_v28  ;;  %3570 = vmatmul.msk.f32.gmra.mxu3 %vm160_vm0, %v1690_v27  ;;  %v1932_v30 = vadd.f32 %v1690_v27, %v1674_v22 }
 0x2f6   : > { %v1603_v31 = vpop.f32.mrf.mxu1 }
 0x2f7   : > { %v1675_v32 = vmul.f32 %v1627_v29, %v5267_v12  ;;  %v1643_v33 = vsub.f32 %v1603_v31, %v1361_v26  ;;  %3586 = vmatmul.msk.f32.gmra.mxu0 %vm160_vm0, %v1932_v30 }
 0x2f9   : > { %v1659_v34 = vsub.f32 %v1643_v33, %v1474_v28  ;;  %3555 = vmatmul.msk.f32.gmra.mxu2 %vm160_vm0, %v1675_v32  ;;  %v1364_v35 = vpop.f32.mrf.mxu3 }
 0x2fb   : > { %v1691_v36 = vmul.f32 %v1659_v34, %v5267_v12 }
 0x2fc   : > { %v1477_v37 = vpop.f32.mrf.mxu0 }
 0x2fd   : > { %v1628_v38 = vsub.f32 %v1364_v35, %v1477_v37  ;;  %3571 = vmatmul.msk.f32.gmra.mxu3 %vm160_vm0, %v1691_v36  ;;  %v1933_v39 = vadd.f32 %v1691_v36, %v1675_v32 }
 0x2fe   : > { %v1606_v40 = vpop.f32.mrf.mxu1 }
 0x2ff   : > { %v1676_v41 = vmul.f32 %v1628_v38, %v5266_v13  ;;  %v1644_v42 = vsub.f32 %v1606_v40, %v1364_v35  ;;  %3587 = vmatmul.msk.f32.gmra.mxu0 %vm160_vm0, %v1933_v39 }
 0x301   : > { %v1660_v43 = vsub.f32 %v1644_v42, %v1477_v37  ;;  %3556 = vmatmul.msk.f32.gmra.mxu2 %vm160_vm0, %v1676_v41  ;;  %v1367_v44 = vpop.f32.mrf.mxu3 }
 0x303   : > { %v1692_v45 = vmul.f32 %v1660_v43, %v5266_v13 }
 0x304   : > { %v1480_v46 = vpop.f32.mrf.mxu0 }
 0x305   : > { %v1629_v47 = vsub.f32 %v1367_v44, %v1480_v46  ;;  %3572 = vmatmul.msk.f32.gmra.mxu3 %vm160_vm0, %v1692_v45  ;;  %v1934_v18 = vadd.f32 %v1692_v45, %v1676_v41 }
 0x306   : > { %v1609_v22 = vpop.f32.mrf.mxu1 }
 0x307   : > { %v1677_v23 = vmul.f32 %v1629_v47, %v5267_v12  ;;  %v1645_v24 = vsub.f32 %v1609_v22, %v1367_v44  ;;  %3588 = vmatmul.msk.f32.gmra.mxu0 %vm160_vm0, %v1934_v18 }
 0x309   : > { %v1661_v26 = vsub.f32 %v1645_v24, %v1480_v46  ;;  %3557 = vmatmul.msk.f32.gmra.mxu2 %vm160_vm0, %v1677_v23  ;;  %v1370_v27 = vpop.f32.mrf.mxu3 }
 0x30b   : > { %v1693_v28 = vmul.f32 %v1661_v26, %v5267_v12  ;;  %v3889_v12 = vld [vmem:[#allocation12 + $0x40] sm:$0xff] }
 0x30c   : > { %v1483_v29 = vpop.f32.mrf.mxu0 }
 0x30d   : > { %v1630_v30 = vsub.f32 %v1370_v27, %v1483_v29  ;;  %3573 = vmatmul.msk.f32.gmra.mxu3 %vm160_vm0, %v1693_v28  ;;  %v1935_v31 = vadd.f32 %v1693_v28, %v1677_v23 }
 0x30e   : > { %v1612_v32 = vpop.f32.mrf.mxu1 }
 0x30f   : > { %v1678_v33 = vmul.f32 %v1630_v30, %v5266_v13  ;;  %v1646_v34 = vsub.f32 %v1612_v32, %v1370_v27  ;;  %3589 = vmatmul.msk.f32.gmra.mxu0 %vm160_vm0, %v1935_v31 }
 0x311   : > { %v1662_v35 = vsub.f32 %v1646_v34, %v1483_v29  ;;  %3558 = vmatmul.msk.f32.gmra.mxu2 %vm160_vm0, %v1678_v33 }
 0x313   : > { %v1694_v36 = vmul.f32 %v1662_v35, %v5266_v13 }
 0x315   : > { %3574 = vmatmul.msk.f32.gmra.mxu3 %vm160_vm0, %v1694_v36  ;;  %v1936_v37 = vadd.f32 %v1694_v36, %v1678_v33 }
 0x317   : > { %3590 = vmatmul.msk.f32.gmra.mxu0 %vm160_vm0, %v1936_v37 }
 0x31c   : > { %v1760_v38 = vpop.f32.mrf.mxu2  ;;  %v2002_v39 = vpop.f32.mrf.mxu0 }
 0x31d   : > { %v2066_v40 = vsub.f32 %v2002_v39, %v1760_v38 }
 0x320   : > { %v1873_v41 = vpop.f32.mrf.mxu3 }
 0x321   : > { %v2082_v42 = vsub.f32 %v2066_v40, %v1873_v41  ;;  %v2050_v43 = vsub.f32 %v1760_v38, %v1873_v41 }
 0x323   : > { %2354 = vxpose.xlu2.b32.start [1/2] (short) (narrow) %v2082_v42, 16  ;;  %2098 = vxpose.xlu1.b32.start [1/2] (short) (narrow) %v2050_v43, 16 }
 0x324   : > { %v1763_v44 = vpop.f32.mrf.mxu2  ;;  %v2005_v45 = vpop.f32.mrf.mxu0 }
 0x325   : > { %v2067_v46 = vsub.f32 %v2005_v45, %v1763_v44 }
 0x328   : > { %v1876_v47 = vpop.f32.mrf.mxu3 }
 0x329   : > { %v2051_v18 = vsub.f32 %v1763_v44, %v1876_v47  ;;  %v2083_v22 = vsub.f32 %v2067_v46, %v1876_v47 }
 0x32b   : > { %2355 = vxpose.xlu2.b32.end [2/2] (short) (narrow) %v2083_v22, 16  ;;  %2099 = vxpose.xlu1.b32.end [2/2] (short) (narrow) %v2051_v18, 16 }
 0x32c   : > { %v1766_v23 = vpop.f32.mrf.mxu2  ;;  %v2008_v24 = vpop.f32.mrf.mxu0 }
 0x32d   : > { %v2068_v26 = vsub.f32 %v2008_v24, %v1766_v23 }
 0x330   : > { %v1879_v27 = vpop.f32.mrf.mxu3 }
 0x331   : > { %v2084_v28 = vsub.f32 %v2068_v26, %v1879_v27  ;;  %v2052_v29 = vsub.f32 %v1766_v23, %v1879_v27 }
 0x333   : > { %2386 = vxpose.xlu1.b32.start [1/2] (short) (narrow) %v2084_v28, 16  ;;  %2130 = vxpose.xlu0.b32.start [1/2] (short) (narrow) %v2052_v29, 16 }
 0x334   : > { %v1769_v30 = vpop.f32.mrf.mxu2  ;;  %v2011_v31 = vpop.f32.mrf.mxu0 }
 0x335   : > { %v2069_v32 = vsub.f32 %v2011_v31, %v1769_v30 }
 0x338   : > { %v1882_v33 = vpop.f32.mrf.mxu3 }
 0x339   : > { %v2053_v34 = vsub.f32 %v1769_v30, %v1882_v33  ;;  %v2085_v35 = vsub.f32 %v2069_v32, %v1882_v33 }
 0x33b   : > { %2387 = vxpose.xlu1.b32.end [2/2] (short) (narrow) %v2085_v35, 16  ;;  %2131 = vxpose.xlu0.b32.end [2/2] (short) (narrow) %v2053_v34, 16 }
 0x33c   : > { %v1772_v36 = vpop.f32.mrf.mxu2  ;;  %v2014_v37 = vpop.f32.mrf.mxu0 }
 0x33d   : > { %v2070_v38 = vsub.f32 %v2014_v37, %v1772_v36 }
 0x340   : > { %v1885_v39 = vpop.f32.mrf.mxu3 }
 0x341   : > { %v2086_v40 = vsub.f32 %v2070_v38, %v1885_v39  ;;  %v2054_v41 = vsub.f32 %v1772_v36, %v1885_v39 }
 0x343   : > { %2418 = vxpose.xlu0.b32.start [1/2] (short) (narrow) %v2086_v40, 16  ;;  %2162 = vxpose.xlu2.b32.start [1/2] (short) (narrow) %v2054_v41, 16 }
 0x344   : > { %v1775_v42 = vpop.f32.mrf.mxu2  ;;  %v2017_v43 = vpop.f32.mrf.mxu0 }
 0x345   : > { %v2071_v44 = vsub.f32 %v2017_v43, %v1775_v42 }
 0x348   : > { %v1888_v45 = vpop.f32.mrf.mxu3 }
 0x349   : > { %v2055_v46 = vsub.f32 %v1775_v42, %v1888_v45  ;;  %v2087_v47 = vsub.f32 %v2071_v44, %v1888_v45 }
 0x34b   : > { %2419 = vxpose.xlu0.b32.end [2/2] (short) (narrow) %v2087_v47, 16  ;;  %2163 = vxpose.xlu2.b32.end [2/2] (short) (narrow) %v2055_v46, 16 }
 0x34c   : > { %v1778_v18 = vpop.f32.mrf.mxu2  ;;  %v2020_v22 = vpop.f32.mrf.mxu0 }
 0x34d   : > { %v2072_v23 = vsub.f32 %v2020_v22, %v1778_v18 }
 0x350   : > { %v1891_v24 = vpop.f32.mrf.mxu3 }
 0x351   : > { %v2088_v26 = vsub.f32 %v2072_v23, %v1891_v24  ;;  %v2056_v27 = vsub.f32 %v1778_v18, %v1891_v24 }
 0x353   : > { %2450 = vxpose.xlu2.b32.start [1/2] (short) (narrow) %v2088_v26, 16  ;;  %2194 = vxpose.xlu1.b32.start [1/2] (short) (narrow) %v2056_v27, 16 }
 0x354   : > { %v1781_v28 = vpop.f32.mrf.mxu2  ;;  %v2023_v29 = vpop.f32.mrf.mxu0 }
 0x355   : > { %v2073_v30 = vsub.f32 %v2023_v29, %v1781_v28 }
 0x358   : > { %v1894_v31 = vpop.f32.mrf.mxu3 }
 0x359   : > { %v2057_v32 = vsub.f32 %v1781_v28, %v1894_v31  ;;  %v2089_v33 = vsub.f32 %v2073_v30, %v1894_v31 }
 0x35b   : > { %2451 = vxpose.xlu2.b32.end [2/2] (short) (narrow) %v2089_v33, 16  ;;  %2195 = vxpose.xlu1.b32.end [2/2] (short) (narrow) %v2057_v32, 16 }
 0x35c   : > { %v1784_v34 = vpop.f32.mrf.mxu2  ;;  %v2026_v35 = vpop.f32.mrf.mxu0 }
 0x35d   : > { %v2074_v36 = vsub.f32 %v2026_v35, %v1784_v34 }
 0x360   : > { %v1897_v37 = vpop.f32.mrf.mxu3 }
 0x361   : > { %v2090_v38 = vsub.f32 %v2074_v36, %v1897_v37  ;;  %v2058_v39 = vsub.f32 %v1784_v34, %v1897_v37 }
 0x363   : > { %2482 = vxpose.xlu1.b32.start [1/2] (short) (narrow) %v2090_v38, 16  ;;  %2226 = vxpose.xlu0.b32.start [1/2] (short) (narrow) %v2058_v39, 16 }
 0x364   : > { %v1787_v40 = vpop.f32.mrf.mxu2  ;;  %v2029_v41 = vpop.f32.mrf.mxu0 }
 0x365   : > { %v2075_v42 = vsub.f32 %v2029_v41, %v1787_v40 }
 0x368   : > { %v1900_v43 = vpop.f32.mrf.mxu3 }
 0x369   : > { %v2059_v44 = vsub.f32 %v1787_v40, %v1900_v43  ;;  %v2091_v45 = vsub.f32 %v2075_v42, %v1900_v43 }
 0x36b   : > { %2483 = vxpose.xlu1.b32.end [2/2] (short) (narrow) %v2091_v45, 16  ;;  %2227 = vxpose.xlu0.b32.end [2/2] (short) (narrow) %v2059_v44, 16 }
 0x36c   : > { %v1790_v46 = vpop.f32.mrf.mxu2  ;;  %v2032_v47 = vpop.f32.mrf.mxu0 }
 0x36d   : > { %v2076_v18 = vsub.f32 %v2032_v47, %v1790_v46 }
 0x370   : > { %v1903_v22 = vpop.f32.mrf.mxu3 }
 0x371   : > { %v2092_v23 = vsub.f32 %v2076_v18, %v1903_v22  ;;  %v2060_v24 = vsub.f32 %v1790_v46, %v1903_v22 }
 0x373   : > { %2514 = vxpose.xlu0.b32.start [1/2] (short) (narrow) %v2092_v23, 16  ;;  %2258 = vxpose.xlu2.b32.start [1/2] (short) (narrow) %v2060_v24, 16 }
 0x374   : > { %v1793_v26 = vpop.f32.mrf.mxu2  ;;  %v2035_v27 = vpop.f32.mrf.mxu0 }
 0x375   : > { %v2077_v28 = vsub.f32 %v2035_v27, %v1793_v26 }
 0x378   : > { %v1906_v29 = vpop.f32.mrf.mxu3 }
 0x379   : > { %v2061_v30 = vsub.f32 %v1793_v26, %v1906_v29  ;;  %v2093_v31 = vsub.f32 %v2077_v28, %v1906_v29 }
 0x37b   : > { %2515 = vxpose.xlu0.b32.end [2/2] (short) (narrow) %v2093_v31, 16  ;;  %2259 = vxpose.xlu2.b32.end [2/2] (short) (narrow) %v2061_v30, 16 }
 0x37c   : > { %v1796_v32 = vpop.f32.mrf.mxu2  ;;  %v2038_v33 = vpop.f32.mrf.mxu0 }
 0x37d   : > { %v2078_v34 = vsub.f32 %v2038_v33, %v1796_v32 }
 0x380   : > { %v1909_v35 = vpop.f32.mrf.mxu3 }
 0x381   : > { %v2094_v36 = vsub.f32 %v2078_v34, %v1909_v35  ;;  %v2062_v37 = vsub.f32 %v1796_v32, %v1909_v35 }
 0x383   : > { %2546 = vxpose.xlu2.b32.start [1/2] (short) (narrow) %v2094_v36, 16  ;;  %2290 = vxpose.xlu1.b32.start [1/2] (short) (narrow) %v2062_v37, 16 }
 0x384   : > { %v1799_v38 = vpop.f32.mrf.mxu2  ;;  %v2041_v39 = vpop.f32.mrf.mxu0 }
 0x385   : > { %v2079_v40 = vsub.f32 %v2041_v39, %v1799_v38 }
 0x388   : > { %v1912_v41 = vpop.f32.mrf.mxu3 }
 0x389   : > { %v2063_v42 = vsub.f32 %v1799_v38, %v1912_v41  ;;  %v2095_v43 = vsub.f32 %v2079_v40, %v1912_v41 }
 0x38b   : > { %2547 = vxpose.xlu2.b32.end [2/2] (short) (narrow) %v2095_v43, 16  ;;  %2291 = vxpose.xlu1.b32.end [2/2] (short) (narrow) %v2063_v42, 16 }
 0x38c   : > { %v1802_v44 = vpop.f32.mrf.mxu2  ;;  %v2044_v45 = vpop.f32.mrf.mxu0 }
 0x38d   : > { %v2080_v46 = vsub.f32 %v2044_v45, %v1802_v44 }
 0x390   : > { %v1915_v47 = vpop.f32.mrf.mxu3 }
 0x391   : > { %v2096_v18 = vsub.f32 %v2080_v46, %v1915_v47  ;;  %v2064_v22 = vsub.f32 %v1802_v44, %v1915_v47 }
 0x393   : > { %2578 = vxpose.xlu1.b32.start [1/2] (short) (narrow) %v2096_v18, 16  ;;  %2322 = vxpose.xlu0.b32.start [1/2] (short) (narrow) %v2064_v22, 16 }
 0x394   : > { %v1805_v23 = vpop.f32.mrf.mxu2  ;;  %v2047_v24 = vpop.f32.mrf.mxu0 }
 0x395   : > { %v2081_v26 = vsub.f32 %v2047_v24, %v1805_v23 }
 0x398   : > { %v1918_v27 = vpop.f32.mrf.mxu3 }
 0x399   : > { %v2065_v28 = vsub.f32 %v1805_v23, %v1918_v27  ;;  %v2097_v29 = vsub.f32 %v2081_v26, %v1918_v27 }
 0x39b   : > { %2579 = vxpose.xlu1.b32.end [2/2] (short) (narrow) %v2097_v29, 16  ;;  %2323 = vxpose.xlu0.b32.end [2/2] (short) (narrow) %v2065_v28, 16 }
 0x3bc   : > { %v2370_v30 = vpop.trf.xlu2 }
 0x3bd   : > { %3607 = vmatmul.msk.f32.vlgmr.msra.gmra.mxu2 %vm160_vm0, %v2370_v30 }
 0x3c4   : > { %v2371_v31 = vpop.trf.xlu2 }
 0x3c5   : > { %3608 = vmatmul.msk.f32.gmra.mxu2 %vm160_vm0, %v2371_v31 }
 0x3c7   : > { %v2114_v32 = vpop.trf.xlu1 }
 0x3c8   : > { %v2836_v33 = vadd.f32 %v2370_v30, %v2114_v32  ;;  %3591 = vmatmul.msk.f32.vlgmr.msra.gmra.mxu1 %vm160_vm0, %v2114_v32 }
 0x3ca   : > { %3623 = vmatmul.msk.f32.vlgmr.msra.gmra.mxu3 %vm160_vm0, %v2836_v33 }
 0x3cf   : > { %v2115_v34 = vpop.trf.xlu1 }
 0x3d0   : > { %v2837_v35 = vadd.f32 %v2371_v31, %v2115_v34  ;;  %3592 = vmatmul.msk.f32.gmra.mxu1 %vm160_vm0, %v2115_v34 }
 0x3d2   : > { %3624 = vmatmul.msk.f32.gmra.mxu3 %vm160_vm0, %v2837_v35 }
 0x3d7   : > { %v2402_v36 = vpop.trf.xlu1  ;;  %v2146_v37 = vpop.trf.xlu0 }
 0x3d8   : > { %v2838_v38 = vadd.f32 %v2402_v36, %v2146_v37  ;;  %3593 = vmatmul.msk.f32.gmra.mxu1 %vm160_vm0, %v2146_v37  ;;  %3609 = vmatmul.msk.f32.gmra.mxu2 %vm160_vm0, %v2402_v36 }
 0x3da   : > { %3625 = vmatmul.msk.f32.gmra.mxu3 %vm160_vm0, %v2838_v38 }
 0x3dc   : > { %v2178_v39 = vpop.trf.xlu2 }
 0x3df   : > { %v2403_v40 = vpop.trf.xlu1  ;;  %v2147_v41 = vpop.trf.xlu0 }
 0x3e0   : > { %v2839_v42 = vadd.f32 %v2403_v40, %v2147_v41  ;;  %3594 = vmatmul.msk.f32.gmra.mxu1 %vm160_vm0, %v2147_v41  ;;  %3610 = vmatmul.msk.f32.gmra.mxu2 %vm160_vm0, %v2403_v40 }
 0x3e2   : > { %3626 = vmatmul.msk.f32.gmra.mxu3 %vm160_vm0, %v2839_v42 }
 0x3e4   : > { %v2179_v45 = vpop.trf.xlu2 }
 0x3e7   : > { %v2434_v43 = vpop.trf.xlu0 }
 0x3e8   : > { %v2840_v44 = vadd.f32 %v2434_v43, %v2178_v39  ;;  %3595 = vmatmul.msk.f32.gmra.mxu1 %vm160_vm0, %v2178_v39  ;;  %3611 = vmatmul.msk.f32.gmra.mxu2 %vm160_vm0, %v2434_v43 }
 0x3ea   : > { %3627 = vmatmul.msk.f32.gmra.mxu3 %vm160_vm0, %v2840_v44 }
 0x3ec   : > { %v2466_v18 = vpop.trf.xlu2 }
 0x3ef   : > { %v2435_v46 = vpop.trf.xlu0 }
 0x3f0   : > { %v2841_v47 = vadd.f32 %v2435_v46, %v2179_v45  ;;  %3596 = vmatmul.msk.f32.gmra.mxu1 %vm160_vm0, %v2179_v45  ;;  %3612 = vmatmul.msk.f32.gmra.mxu2 %vm160_vm0, %v2435_v46 }
 0x3f2   : > { %3628 = vmatmul.msk.f32.gmra.mxu3 %vm160_vm0, %v2841_v47 }
 0x3f4   : > { %v2467_v24 = vpop.trf.xlu2 }
 0x3f7   : > { %v2210_v22 = vpop.trf.xlu1 }
 0x3f8   : > { %v2842_v23 = vadd.f32 %v2466_v18, %v2210_v22  ;;  %3597 = vmatmul.msk.f32.gmra.mxu1 %vm160_vm0, %v2210_v22  ;;  %3613 = vmatmul.msk.f32.gmra.mxu2 %vm160_vm0, %v2466_v18 }
 0x3fa   : > { %3629 = vmatmul.msk.f32.gmra.mxu3 %vm160_vm0, %v2842_v23 }
 0x3ff   : > { %v2211_v26 = vpop.trf.xlu1 }
 0x400   : > { %v2843_v27 = vadd.f32 %v2467_v24, %v2211_v26  ;;  %3598 = vmatmul.msk.f32.gmra.mxu1 %vm160_vm0, %v2211_v26  ;;  %3614 = vmatmul.msk.f32.gmra.mxu2 %vm160_vm0, %v2467_v24 }
 0x402   : > { %3630 = vmatmul.msk.f32.gmra.mxu3 %vm160_vm0, %v2843_v27 }
 0x407   : > { %v2498_v28 = vpop.trf.xlu1  ;;  %v2242_v29 = vpop.trf.xlu0 }
 0x408   : > { %v2844_v30 = vadd.f32 %v2498_v28, %v2242_v29  ;;  %3599 = vmatmul.msk.f32.gmra.mxu1 %vm160_vm0, %v2242_v29  ;;  %3615 = vmatmul.msk.f32.gmra.mxu2 %vm160_vm0, %v2498_v28 }
 0x40a   : > { %3631 = vmatmul.msk.f32.gmra.mxu3 %vm160_vm0, %v2844_v30 }
 0x40c   : > { %v2274_v31 = vpop.trf.xlu2 }
 0x40f   : > { %v2499_v32 = vpop.trf.xlu1  ;;  %v2243_v33 = vpop.trf.xlu0 }
 0x410   : > { %v2845_v34 = vadd.f32 %v2499_v32, %v2243_v33  ;;  %3600 = vmatmul.msk.f32.gmra.mxu1 %vm160_vm0, %v2243_v33  ;;  %3616 = vmatmul.msk.f32.gmra.mxu2 %vm160_vm0, %v2499_v32 }
 0x412   : > { %3632 = vmatmul.msk.f32.gmra.mxu3 %vm160_vm0, %v2845_v34 }
 0x414   : > { %v2275_v37 = vpop.trf.xlu2 }
 0x417   : > { %v2530_v35 = vpop.trf.xlu0 }
 0x418   : > { %v2846_v36 = vadd.f32 %v2530_v35, %v2274_v31  ;;  %3601 = vmatmul.msk.f32.gmra.mxu1 %vm160_vm0, %v2274_v31  ;;  %3617 = vmatmul.msk.f32.gmra.mxu2 %vm160_vm0, %v2530_v35  ;;  %v3872_v35 = vld [vmem:[#allocation12] sm:$0xff] }
 0x41a   : > { %3633 = vmatmul.msk.f32.gmra.mxu3 %vm160_vm0, %v2846_v36 }
 0x41c   : > { %v2562_v40 = vpop.trf.xlu2 }
 0x41f   : > { %v2531_v38 = vpop.trf.xlu0 }
 0x420   : > { %v2847_v39 = vadd.f32 %v2531_v38, %v2275_v37  ;;  %3602 = vmatmul.msk.f32.gmra.mxu1 %vm160_vm0, %v2275_v37  ;;  %3618 = vmatmul.msk.f32.gmra.mxu2 %vm160_vm0, %v2531_v38  ;;  %v3873_v37 = vld [vmem:[#allocation12 + $0x80] sm:$0xff] }
 0x422   : > { %3634 = vmatmul.msk.f32.gmra.mxu3 %vm160_vm0, %v2847_v39 }
 0x424   : > { %v2563_v43 = vpop.trf.xlu2 }
 0x427   : > { %v2306_v41 = vpop.trf.xlu1 }
 0x428   : > { %v2848_v42 = vadd.f32 %v2562_v40, %v2306_v41  ;;  %3603 = vmatmul.msk.f32.gmra.mxu1 %vm160_vm0, %v2306_v41  ;;  %3619 = vmatmul.msk.f32.gmra.mxu2 %vm160_vm0, %v2562_v40 }
 0x42a   : > { %3635 = vmatmul.msk.f32.gmra.mxu3 %vm160_vm0, %v2848_v42 }
 0x42f   : > { %v2307_v44 = vpop.trf.xlu1 }
 0x430   : > { %v2849_v45 = vadd.f32 %v2563_v43, %v2307_v44  ;;  %3604 = vmatmul.msk.f32.gmra.mxu1 %vm160_vm0, %v2307_v44  ;;  %3620 = vmatmul.msk.f32.gmra.mxu2 %vm160_vm0, %v2563_v43 }
 0x432   : > { %3636 = vmatmul.msk.f32.gmra.mxu3 %vm160_vm0, %v2849_v45 }
 0x437   : > { %v2594_v46 = vpop.trf.xlu1  ;;  %v2338_v47 = vpop.trf.xlu0 }
 0x438   : > { %v2850_v18 = vadd.f32 %v2594_v46, %v2338_v47  ;;  %3605 = vmatmul.msk.f32.gmra.mxu1 %vm160_vm0, %v2338_v47  ;;  %3621 = vmatmul.msk.f32.gmra.mxu2 %vm160_vm0, %v2594_v46  ;;  %v3874_v47 = vld [vmem:[#allocation12 + $0x8] sm:$0xff] }
 0x43a   : > { %3637 = vmatmul.msk.f32.gmra.mxu3 %vm160_vm0, %v2850_v18 }
 0x43f   : > { %v2595_v22 = vpop.trf.xlu1  ;;  %v2339_v23 = vpop.trf.xlu0 }
 0x440   : > { %v2851_v24 = vadd.f32 %v2595_v22, %v2339_v23  ;;  %3606 = vmatmul.msk.f32.gmra.mxu1 %vm160_vm0, %v2339_v23  ;;  %3622 = vmatmul.msk.f32.gmra.mxu2 %vm160_vm0, %v2595_v22  ;;  %v2788_v26 = vpop.f32.mrf.mxu2  ;;  %v3875_v22 = vld [vmem:[#allocation12 + $0x88] sm:$0xff] }
 0x442   : > { %3638 = vmatmul.msk.f32.gmra.mxu3 %vm160_vm0, %v2851_v24 }
 0x445   : > { %v2675_v27 = vpop.f32.mrf.mxu1 }
 0x446   : > { %v2965_v28 = vsub.f32 %v2675_v27, %v2788_v26 }
 0x448   : > { %v2791_v29 = vpop.f32.mrf.mxu2  ;;  %v3013_v36 = vmul.f32 %v3872_v35, %v2965_v28  ;;  %v3109_v38 = vmul.f32 %v3873_v37, %v2965_v28 }
 0x44d   : > { %v2678_v30 = vpop.f32.mrf.mxu1  ;;  %v2917_v31 = vpop.f32.mrf.mxu3 }
 0x44e   : > { %v2966_v32 = vsub.f32 %v2678_v30, %v2791_v29  ;;  %v2981_v33 = vsub.f32 %v2917_v31, %v2675_v27 }
 0x450   : > { %v2997_v34 = vsub.f32 %v2981_v33, %v2788_v26  ;;  %v3014_v18 = vmul.f32 %v3874_v47, %v2966_v32  ;;  %v3110_v23 = vmul.f32 %v3875_v22, %v2966_v32 }
 0x452   : > { %v3029_v39 = vmul.f32 %v3873_v37, %v2997_v34  ;;  %v3093_v40 = vmul.f32 %v3872_v35, %v2997_v34  ;;  %v3876_v35 = vld [vmem:[#allocation12 + $0x10] sm:$0xff] }
 0x454   : > { %v3045_v41 = vadd.f32 %v3029_v39, %v3013_v36  ;;  %v3125_v42 = vsub.f32 %v3093_v40, %v3109_v38  ;;  %v3877_v38 = vld [vmem:[#allocation12 + $0x90] sm:$0xff] }
 0x455   : > { %v2681_v43 = vpop.f32.mrf.mxu1  ;;  %v2920_v44 = vpop.f32.mrf.mxu3 }
 0x456   : > { %v2982_v45 = vsub.f32 %v2920_v44, %v2678_v30 }
 0x458   : > { %v2998_v46 = vsub.f32 %v2982_v45, %v2791_v29 }
 0x45a   : > { %v3030_v24 = vmul.f32 %v3875_v22, %v2998_v46  ;;  %v3094_v4 = vmul.f32 %v3874_v47, %v2998_v46 }
 0x45b   : > { %v2794_v27 = vpop.f32.mrf.mxu2 }
 0x45c   : > { %v3046_v26 = vadd.f32 %v3030_v24, %v3014_v18  ;;  %v3126_v31 = vsub.f32 %v3094_v4, %v3110_v23  ;;  %v2967_v33 = vsub.f32 %v2681_v43, %v2794_v27  ;;  %v3061_v4 = vsel %vm160_vm0, %v3045_v41, 0.0 }
 0x45d   : > { %v2684_v9 = vpop.f32.mrf.mxu1  ;;  %v2923_v28 = vpop.f32.mrf.mxu3  ;;  %v3141_v18 = vsel %vm160_vm0, %v3125_v42, 0.0 }
 0x45e   : > { %v2983_v37 = vsub.f32 %v2923_v28, %v2681_v43  ;;  %v3015_v36 = vmul.f32 %v3876_v35, %v2967_v33  ;;  %v3111_v39 = vmul.f32 %v3877_v38, %v2967_v33  ;;  %v3878_v28 = vld [vmem:[#allocation12 + $0x18] sm:$0xff]  ;;  %v3068_v42 = vsel %vm160_vm0, %v3046_v26, 0.0 }
 0x460   : > { %v2999_v34 = vsub.f32 %v2983_v37, %v2794_v27 }
 0x462   : > { %v3031_v30 = vmul.f32 %v3877_v38, %v2999_v34  ;;  %v3095_v29 = vmul.f32 %v3876_v35, %v2999_v34  ;;  %v3879_v34 = vld [vmem:[#allocation12 + $0x98] sm:$0xff] }
 0x463   : > { %v2797_v40 = vpop.f32.mrf.mxu2 }
 0x464   : > { %v2968_v44 = vsub.f32 %v2684_v9, %v2797_v40  ;;  %v3047_v45 = vadd.f32 %v3031_v30, %v3015_v36  ;;  %v3127_v32 = vsub.f32 %v3095_v29, %v3111_v39 }
 0x465   : > { %v2687_v22 = vpop.f32.mrf.mxu1  ;;  %v2926_v46 = vpop.f32.mrf.mxu3 }
 0x466   : > { %v2984_v47 = vsub.f32 %v2926_v46, %v2684_v9  ;;  %v3062_v43 = vsel %vm160_vm0, %v3047_v45, 0.0  ;;  %v3142_v23 = vsel %vm160_vm0, %v3127_v32, 0.0  ;;  %v3016_v37 = vmul.f32 %v3878_v28, %v2968_v44 }
 0x467   : > { %v3063_v24 = vadd.f32 %v3062_v43, %v3061_v4  ;;  %v3143_v27 = vadd.f32 %v3142_v23, %v3141_v18  ;;  %v3112_v35 = vmul.f32 %v3879_v34, %v2968_v44  ;;  %v3148_v45 = vsel %vm160_vm0, %v3126_v31, 0.0  ;;  %v3880_v43 = vld [vmem:[#allocation12 + $0x20] sm:$0xff] }
 0x468   : > { %v3000_v33 = vsub.f32 %v2984_v47, %v2797_v40 }
 0x46a   : > { %v3032_v36 = vmul.f32 %v3879_v34, %v3000_v33  ;;  %v3096_v38 = vmul.f32 %v3878_v28, %v3000_v33  ;;  %v3881_v33 = vld [vmem:[#allocation12 + $0xa0] sm:$0xff] }
 0x46b   : > { %v2800_v39 = vpop.f32.mrf.mxu2 }
 0x46c   : > { %v3048_v30 = vadd.f32 %v3032_v36, %v3016_v37  ;;  %v3128_v9 = vsub.f32 %v3096_v38, %v3112_v35  ;;  %v2969_v29 = vsub.f32 %v2687_v22, %v2800_v39 }
 0x46d   : > { %v2690_v41 = vpop.f32.mrf.mxu1  ;;  %v2929_v46 = vpop.f32.mrf.mxu3 }
 0x46e   : > { %v3069_v32 = vsel %vm160_vm0, %v3048_v30, 0.0  ;;  %v3149_v40 = vsel %vm160_vm0, %v3128_v9, 0.0  ;;  %v2985_v18 = vsub.f32 %v2929_v46, %v2687_v22  ;;  %v3017_v23 = vmul.f32 %v3880_v43, %v2969_v29  ;;  %v3882_v46 = vld [vmem:[#allocation12 + $0x28] sm:$0xff] }
 0x46f   : > { %v3070_v47 = vadd.f32 %v3069_v32, %v3068_v42  ;;  %v3150_v4 = vadd.f32 %v3149_v40, %v3148_v45  ;;  %v3113_v28 = vmul.f32 %v3881_v33, %v2969_v29  ;;  %v3883_v32 = vld [vmem:[#allocation12 + $0xa8] sm:$0xff] }
 0x470   : > { %v3001_v44 = vsub.f32 %v2985_v18, %v2800_v39 }
 0x472   : > { %v3033_v37 = vmul.f32 %v3881_v33, %v3001_v44  ;;  %v3097_v34 = vmul.f32 %v3880_v43, %v3001_v44 }
 0x473   : > { %v2803_v35 = vpop.f32.mrf.mxu2 }
 0x474   : > { %v2970_v36 = vsub.f32 %v2690_v41, %v2803_v35  ;;  %v3049_v38 = vadd.f32 %v3033_v37, %v3017_v23  ;;  %v3129_v26 = vsub.f32 %v3097_v34, %v3113_v28 }
 0x475   : > { %v2693_v0 = vpop.f32.mrf.mxu1  ;;  %v2932_v31 = vpop.f32.mrf.mxu3 }
 0x476   : > { %v2986_v1 = vsub.f32 %v2932_v31, %v2690_v41  ;;  %v3064_v30 = vsel %vm160_vm0, %v3049_v38, 0.0  ;;  %v3144_v9 = vsel %vm160_vm0, %v3129_v26, 0.0  ;;  %v3018_v45 = vmul.f32 %v3882_v46, %v2970_v36  ;;  %v3885_v31 = vld [vmem:[#allocation12 + $0xb0] sm:$0xff] }
 0x477   : > { %v3065_v42 = vadd.f32 %v3064_v30, %v3063_v24  ;;  %v3145_v22 = vadd.f32 %v3144_v9, %v3143_v27  ;;  %v3114_v29 = vmul.f32 %v3883_v32, %v2970_v36 }
 0x478   : > { %v3002_v39 = vsub.f32 %v2986_v1, %v2803_v35  ;;  %v3884_v35 = vld [vmem:[#allocation12 + $0x30] sm:$0xff] }
 0x47a   : > { %v3034_v40 = vmul.f32 %v3883_v32, %v3002_v39  ;;  %v3098_v18 = vmul.f32 %v3882_v46, %v3002_v39 }
 0x47b   : > { %v2806_v44 = vpop.f32.mrf.mxu2 }
 0x47c   : > { %v3050_v43 = vadd.f32 %v3034_v40, %v3018_v45  ;;  %v3130_v23 = vsub.f32 %v3098_v18, %v3114_v29  ;;  %v2971_v33 = vsub.f32 %v2693_v0, %v2806_v44 }
 0x47d   : > { %v2696_v28 = vpop.f32.mrf.mxu1  ;;  %v2935_v37 = vpop.f32.mrf.mxu3 }
 0x47e   : > { %v3071_v41 = vsel %vm160_vm0, %v3050_v43, 0.0  ;;  %v3151_v34 = vsel %vm160_vm0, %v3130_v23, 0.0  ;;  %v2987_v27 = vsub.f32 %v2935_v37, %v2693_v0  ;;  %v3019_v26 = vmul.f32 %v3884_v35, %v2971_v33 }
 0x47f   : > { %v3072_v38 = vadd.f32 %v3071_v41, %v3070_v47  ;;  %v3152_v24 = vadd.f32 %v3151_v34, %v3150_v4  ;;  %v3115_v36 = vmul.f32 %v3885_v31, %v2971_v33 }
 0x480   : > { %v3003_v1 = vsub.f32 %v2987_v27, %v2806_v44 }
 0x482   : > { %v3035_v30 = vmul.f32 %v3885_v31, %v3003_v1  ;;  %v3099_v9 = vmul.f32 %v3884_v35, %v3003_v1 }
 0x483   : > { %v2809_v39 = vpop.f32.mrf.mxu2 }
 0x484   : > { %v3051_v46 = vadd.f32 %v3035_v30, %v3019_v26  ;;  %v3131_v45 = vsub.f32 %v3099_v9, %v3115_v36  ;;  %v2972_v26 = vsub.f32 %v2696_v28, %v2809_v39  ;;  %v3886_v36 = vld [vmem:[#allocation12 + $0xb8] sm:$0xff] }
 0x485   : > { %v2699_v32 = vpop.f32.mrf.mxu1  ;;  %v2938_v29 = vpop.f32.mrf.mxu3 }
 0x486   : > { %v3066_v40 = vsel %vm160_vm0, %v3051_v46, 0.0  ;;  %v3146_v18 = vsel %vm160_vm0, %v3131_v45, 0.0  ;;  %v2988_v34 = vsub.f32 %v2938_v29, %v2696_v28  ;;  %v4912_v29 = vstv %s5221_s0  ;;  %s4325_s0 = smov (%p5119_p1), [#allocation15]  }
 0x487   : > { %v3067_v43 = vadd.f32 %v3066_v40, %v3065_v42  ;;  %v3147_v47 = vadd.f32 %v3146_v18, %v3145_v22  ;;  %v3887_v42 = vld [vmem:[#allocation12 + $0x38] sm:$0xff]  ;;  %v3116_v18 = vmul.f32 %v3886_v36, %v2972_v26  ;;  %v209_v5 = vmul.f32 %v4246_v55, %v4912_v29  ;;  %s3344_s26 = sshll.u32 (%p5119_p1), %s4325_s0, 4  ;;  %s3345_s26 = int_to_ptr.vmem [resolvable:$true] %s3344_s26 }
 0x488   : > { %v3004_v35 = vsub.f32 %v2988_v34, %v2809_v39  ;;  %v3020_v22 = vmul.f32 %v3887_v42, %v2972_v26 }
 0x48a   : > { %v3036_v30 = vmul.f32 %v3886_v36, %v3004_v35  ;;  %v3100_v40 = vmul.f32 %v3887_v42, %v3004_v35  ;;  %v213_v42 = vmul.f32 %v4230_v51, %v4912_v29 }
 0x48b   : > { %v2812_v4 = vpop.f32.mrf.mxu2 }
 0x48c   : > { %v3052_v45 = vadd.f32 %v3036_v30, %v3020_v22  ;;  %v3132_v39 = vsub.f32 %v3100_v40, %v3116_v18  ;;  %v210_v30 = vmul.f32 %v4242_v54, %v4912_v29  ;;  %v4924_v40 = vadd.f32 %v3067_v43, %v209_v5 }
 0x48d   : > { %v2702_v0 = vpop.f32.mrf.mxu1  ;;  %v2941_v44 = vpop.f32.mrf.mxu3  ;;  %v214_v18 = vmul.f32 %v4226_v50, %v4912_v29  ;;  %v4930_v11 = vadd.f32 %v3147_v47, %v213_v42  ;;  %v3893_v42 = vld [vmem:[#allocation12 + $0x48] sm:$0xff] }
 0x48e   : > { %v2989_v2 = vsub.f32 %v2941_v44, %v2699_v32  ;;  %v3073_v28 = vsel %vm160_vm0, %v3052_v45, 0.0  ;;  %v3153_v44 = vsel %vm160_vm0, %v3132_v39, 0.0  ;;  %v2973_v45 = vsub.f32 %v2699_v32, %v2812_v4 }
 0x48f   : > { %v3074_v35 = vadd.f32 %v3073_v28, %v3072_v38  ;;  %v3154_v38 = vadd.f32 %v3153_v44, %v3152_v24  ;;  %v4935_v24 = vmul.f32 %v4246_v55, %v4924_v40 }
 0x490   : > { %v3005_v26 = vsub.f32 %v2989_v2, %v2812_v4  ;;  %v3888_v2 = vld [vmem:[#allocation12 + $0xc0] sm:$0xff]  ;;  %v3021_v13 = vmul.f32 %v3889_v12, %v2973_v45 }
 0x491   : > { %v4928_v8 = vadd.f32 %v3074_v35, %v210_v30  ;;  %v3117_v25 = vmul.f32 %v3888_v2, %v2973_v45  ;;  %v4937_v35 = vadd.f32 %v3154_v38, %v214_v18 }
 0x492   : > { %v3101_v32 = vmul.f32 %v3889_v12, %v3005_v26 }
 0x493   : > { %v2815_v23 = vpop.f32.mrf.mxu2  ;;  %v4941_v12 = vmul.f32 %v4242_v54, %v4928_v8 }
 0x494   : > { %v2974_v5 = vsub.f32 %v2702_v0, %v2815_v23 }
 0x495   : > { %v2705_v37 = vpop.f32.mrf.mxu1  ;;  %v2944_v41 = vpop.f32.mrf.mxu3 }
 0x496   : > { %v2990_v36 = vsub.f32 %v2944_v41, %v2702_v0  ;;  %v3037_v41 = vmul.f32 %v3888_v2, %v3005_v26  ;;  %v3892_v0 = vld [vmem:[#allocation12 + $0x50] sm:$0xff]  ;;  %v3022_v44 = vmul.f32 %v3893_v42, %v2974_v5  ;;  %v3894_v2 = vld [vmem:[#allocation12 + $0xe0] sm:$0xff] }
 0x498   : > { %v3006_v28 = vsub.f32 %v2990_v36, %v2815_v23  ;;  %v3053_v47 = vadd.f32 %v3037_v41, %v3021_v13  ;;  %v3891_v36 = vld [vmem:[#allocation12 + $0xc8] sm:$0xff] }
 0x499   : > { %v3118_v17 = vmul.f32 %v3891_v36, %v2974_v5  ;;  %v3896_v5 = vld [vmem:[#allocation12 + $0xd8] sm:$0xff] }
 0x49a   : > { %v4944_v45 = vmul.f32 %v3893_v42, %v3006_v28 }
 0x49b   : > { %v2818_v33 = vpop.f32.mrf.mxu2 }
 0x49c   : > { %v2975_v39 = vsub.f32 %v2705_v37, %v2818_v33 }
 0x49d   : > { %v4905_v27 = vpop.f32.mrf.mxu1  ;;  %v2947_v1 = vpop.f32.mrf.mxu3 }
 0x49e   : > { %v2991_v6 = vsub.f32 %v2947_v1, %v2705_v37  ;;  %v3038_v37 = vmul.f32 %v3891_v36, %v3006_v28  ;;  %v3023_v23 = vmul.f32 %v3892_v0, %v2975_v39 }
 0x4a0   : > { %v3007_v1 = vsub.f32 %v2991_v6, %v2818_v33  ;;  %v3890_v6 = vld [vmem:[#allocation12 + $0xd0] sm:$0xff]  ;;  %v3054_v16 = vadd.f32 %v3038_v37, %v3022_v44 }
 0x4a1   : > { %v3119_v13 = vmul.f32 %v3890_v6, %v2975_v39 }
 0x4a2   : > { %v3103_v33 = vmul.f32 %v3892_v0, %v3007_v1  ;;  %v3082_v0 = vsel %vm160_vm0, %v3054_v16, 0.0 }
 0x4a3   : > { %v4907_v31 = vpop.f32.mrf.mxu2 }
 0x4a5   : > { %v2950_v9 = vpop.f32.mrf.mxu3  ;;  %v2711_v46 = vpop.f32.mrf.mxu1 }
 0x4a6   : > { %v2992_v43 = vsub.f32 %v2950_v9, %v4905_v27 }
 0x4a8   : > { %v3008_v18 = vsub.f32 %v2992_v43, %v4907_v31  ;;  %v3075_v43 = vsel %vm160_vm0, %v3053_v47, 0.0 }
 0x4ab   : > { %v2824_v3 = vpop.f32.mrf.mxu2 }
 0x4ac   : > { %v2977_v9 = vsub.f32 %v2711_v46, %v2824_v3 }
 0x4ad   : > { %v2953_v34 = vpop.f32.mrf.mxu3  ;;  %v4922_v22 = vpop.f32.mrf.mxu1 }
 0x4ae   : > { %v2993_v7 = vsub.f32 %v2953_v34, %v2711_v46  ;;  %v3039_v34 = vmul.f32 %v3890_v6, %v3007_v1  ;;  %v3135_v1 = vsub.f32 %v3103_v33, %v3119_v13  ;;  %v3025_v28 = vmul.f32 %v3895_v21, %v2977_v9  ;;  %v3899_v13 = vld [vmem:[#allocation12 + $0x68] sm:$0xff] }
 0x4af   : > { %v3134_v6 = vsub.f32 %v4944_v45, %v3118_v17  ;;  %v3898_v17 = vld [vmem:[#allocation12 + $0xe8] sm:$0xff] }
 0x4b0   : > { %v3009_v30 = vsub.f32 %v2993_v7, %v2824_v3  ;;  %v3133_v7 = vsub.f32 %v3101_v32, %v3117_v25  ;;  %v3055_v38 = vadd.f32 %v3039_v34, %v3023_v23  ;;  %v2976_v3 = vsub.f32 %v4905_v27, %v4907_v31 }
 0x4b1   : > { %v4951_v25 = vmul.f32 %v4226_v50, %v4937_v35  ;;  %v3121_v32 = vmul.f32 %v3894_v2, %v2977_v9  ;;  %v3040_v34 = vmul.f32 %v3896_v5, %v3008_v18  ;;  %v3156_v47 = vsel %vm160_vm0, %v3135_v1, 0.0 }
 0x4b2   : > { %v3041_v41 = vmul.f32 %v3894_v2, %v3009_v30  ;;  %v3105_v20 = vmul.f32 %v3895_v21, %v3009_v30  ;;  %v3076_v27 = vsel %vm160_vm0, %v3055_v38, 0.0  ;;  %v3897_v21 = vld [vmem:[#allocation12 + $0x58] sm:$0xff] }
 0x4b3   : > { %v2827_v10 = vpop.f32.mrf.mxu2  ;;  %v3024_v23 = vmul.f32 %v3897_v21, %v2976_v3  ;;  %v3077_v44 = vadd.f32 %v3076_v27, %v3075_v43 }
 0x4b4   : > { %v3057_v31 = vadd.f32 %v3041_v41, %v3025_v28  ;;  %v3137_v36 = vsub.f32 %v3105_v20, %v3121_v32  ;;  %v2978_v37 = vsub.f32 %v4922_v22, %v2827_v10  ;;  %v3900_v41 = vld [vmem:[#allocation12 + $0x70] sm:$0xff] }
 0x4b5   : > { %v2956_v4 = vpop.f32.mrf.mxu3  ;;  %v2717_v19 = vpop.f32.mrf.mxu1  ;;  %v3056_v45 = vadd.f32 %v3040_v34, %v3024_v23 }
 0x4b6   : > { %v2994_v26 = vsub.f32 %v2956_v4, %v4922_v22  ;;  %v3155_v4 = vsel %vm160_vm0, %v3133_v7, 0.0  ;;  %v3104_v7 = vmul.f32 %v3897_v21, %v3008_v18  ;;  %v3078_v20 = vsel %vm160_vm0, %v3057_v31, 0.0 }
 0x4b7   : > { %v3026_v16 = vmul.f32 %v3899_v13, %v2978_v37  ;;  %v3122_v22 = vmul.f32 %v3898_v17, %v2978_v37  ;;  %v3079_v37 = vadd.f32 %v3078_v20, %v3077_v44  ;;  %v3902_v20 = vld [vmem:[#allocation12 + $0x78] sm:$0xff] }
 0x4b8   : > { %v3010_v39 = vsub.f32 %v2994_v26, %v2827_v10  ;;  %v3120_v26 = vmul.f32 %v3896_v5, %v2976_v3  ;;  %v3158_v10 = vsel %vm160_vm0, %v3137_v36, 0.0  ;;  %v3157_v5 = vadd.f32 %v3156_v47, %v3155_v4 }
 0x4b9   : > { %v3083_v4 = vsel %vm160_vm0, %v3056_v45, 0.0 }
 0x4ba   : > { %v3042_v42 = vmul.f32 %v3898_v17, %v3010_v39  ;;  %v3106_v38 = vmul.f32 %v3899_v13, %v3010_v39  ;;  %v3159_v23 = vadd.f32 %v3158_v10, %v3157_v5  ;;  %v3162_v17 = vsel %vm160_vm0, %v3134_v6, 0.0 }
 0x4bb   : > { %v2830_v46 = vpop.f32.mrf.mxu2 }
 0x4bc   : > { %v2979_v33 = vsub.f32 %v2717_v19, %v2830_v46  ;;  %v3058_v43 = vadd.f32 %v3042_v42, %v3026_v16  ;;  %v3138_v39 = vsub.f32 %v3106_v38, %v3122_v22  ;;  %v3903_v16 = vld [vmem:[#allocation12 + $0xf8] sm:$0xff] }
 0x4bd   : > { %v2959_v30 = vpop.f32.mrf.mxu3  ;;  %v2720_v34 = vpop.f32.mrf.mxu1 }
 0x4be   : > { %v2995_v9 = vsub.f32 %v2959_v30, %v2717_v19  ;;  %v3027_v28 = vmul.f32 %v3900_v41, %v2979_v33  ;;  %v3901_v19 = vld [vmem:[#allocation12 + $0xf0] sm:$0xff]  ;;  %v3136_v30 = vsub.f32 %v3104_v7, %v3120_v26  ;;  %v3085_v44 = vsel %vm160_vm0, %v3058_v43, 0.0 }
 0x4bf   : > { %v3123_v32 = vmul.f32 %v3901_v19, %v2979_v33  ;;  %v215_v33 = vmul.f32 %v4222_v49, %v4912_v29 }
 0x4c0   : > { %v3011_v2 = vsub.f32 %v2995_v9, %v2830_v46  ;;  %v211_v46 = vmul.f32 %v4238_v53, %v4912_v29  ;;  %v3163_v7 = vsel %vm160_vm0, %v3136_v30, 0.0 }
 0x4c2   : > { %v3043_v1 = vmul.f32 %v3901_v19, %v3011_v2  ;;  %v3107_v3 = vmul.f32 %v3900_v41, %v3011_v2  ;;  %v3165_v2 = vsel %vm160_vm0, %v3138_v39, 0.0  ;;  %v3084_v19 = vadd.f32 %v3083_v4, %v3082_v0 }
 0x4c3   : > { %v2833_v18 = vpop.f32.mrf.mxu2  ;;  %v212_v0 = vmul.f32 %v4234_v52, %v4912_v29  ;;  %v216_v39 = vmul.f32 %v4218_v48, %v4912_v29 }
 0x4c4   : > { %v3059_v27 = vadd.f32 %v3043_v1, %v3027_v28  ;;  %v3139_v31 = vsub.f32 %v3107_v3, %v3123_v32  ;;  %v2980_v36 = vsub.f32 %v2720_v34, %v2833_v18  ;;  %v3164_v32 = vadd.f32 %v3163_v7, %v3162_v17 }
 0x4c5   : > { %v2962_v21 = vpop.f32.mrf.mxu3  ;;  %v3178_v1 = vmul.f32 %v4230_v51, %v4930_v11  ;;  %v3183_v3 = vadd.f32 %v4951_v25, %v4941_v12 }
 0x4c6   : > { %v2996_v9 = vsub.f32 %v2962_v21, %v2720_v34  ;;  %v3080_v47 = vsel %vm160_vm0, %v3059_v27, 0.0  ;;  %v3160_v26 = vsel %vm160_vm0, %v3139_v31, 0.0  ;;  %v3028_v10 = vmul.f32 %v3902_v20, %v2980_v36 }
 0x4c7   : > { %v3081_v42 = vadd.f32 %v3080_v47, %v3079_v37  ;;  %v3161_v13 = vadd.f32 %v3160_v26, %v3159_v23  ;;  %v3124_v22 = vmul.f32 %v3903_v16, %v2980_v36  ;;  %v3086_v34 = vadd.f32 %v3085_v44, %v3084_v19 }
 0x4c8   : > { %v3012_v38 = vsub.f32 %v2996_v9, %v2833_v18  ;;  %v3182_v36 = vadd.f32 %v3178_v1, %v4935_v24  ;;  %v3187_v9 = vsel %vm160_vm0, %v3183_v3, 0.0 }
 0x4c9   : > { %v4973_v45 = vadd.f32 %v3081_v42, %v211_v46  ;;  %v4975_v28 = vadd.f32 %v3161_v13, %v215_v33  ;;  %v3166_v46 = vadd.f32 %v3165_v2, %v3164_v32 }
 0x4ca   : > { %v3044_v6 = vmul.f32 %v3903_v16, %v3012_v38  ;;  %v3108_v41 = vmul.f32 %v3902_v20, %v3012_v38  ;;  %v3186_v17 = vsel %vm160_vm0, %v3182_v36, 0.0 }
 0x4cb   : > { %v3176_v30 = vmul.f32 %v4238_v53, %v4973_v45  ;;  %v3180_v43 = vmul.f32 %v4222_v49, %v4975_v28  ;;  %v3188_v47 = vadd.f32 %v3187_v9, %v3186_v17 }
 0x4cc   : > { %v3060_v18 = vadd.f32 %v3044_v6, %v3028_v10  ;;  %v3140_v5 = vsub.f32 %v3108_v41, %v3124_v22 }
 0x4cd   : > { %v3184_v21 = vadd.f32 %v3180_v43, %v3176_v30 }
 0x4ce   : > { %v3087_v27 = vsel %vm160_vm0, %v3060_v18, 0.0  ;;  %v3167_v12 = vsel %vm160_vm0, %v3140_v5, 0.0 }
 0x4cf   : > { %v3088_v25 = vadd.f32 %v3087_v27, %v3086_v34  ;;  %v3168_v31 = vadd.f32 %v3167_v12, %v3166_v46  ;;  %v3189_v4 = vsel %vm160_vm0, %v3184_v21, 0.0 }
 0x4d0   : > { %v3190_v26 = vadd.f32 %v3189_v4, %v3188_v47 }
 0x4d1   : > { %v4992_v37 = vadd.f32 %v3088_v25, %v212_v0  ;;  %v4994_v23 = vadd.f32 %v3168_v31, %v216_v39 }
 0x4d3   : > { %v3177_v33 = vmul.f32 %v4234_v52, %v4992_v37  ;;  %v3181_v29 = vmul.f32 %v4218_v48, %v4994_v23 }
 0x4d5   : > { %v3185_v24 = vadd.f32 %v3181_v29, %v3177_v33 }
 0x4d7   : > { %v3191_v7 = vsel %vm160_vm0, %v3185_v24, 0.0 }
 0x4d8   : > { %v3192_v42 = vadd.f32 %v3191_v7, %v3190_v26 }
 0x4da   : > { %3193 = vadd.xlane.f32.xlu2 %v3192_v42 }
 0x54d   : > { %v3194_v13 = vpop.xlane.xlu2 %3193 }
 0x54e   : > { %v3195_v38 = vrot.slane %v3194_v13, 4 }
 0x550   : > { %v3196_v44 = vadd.f32 %v3195_v38, %v3194_v13 }
 0x552   : > { %v3197_v2 = vrot.slane %v3196_v44, 2 }
 0x554   : > { %v3198_v20 = vadd.f32 %v3197_v2, %v3196_v44 }
 0x556   : > { %v3199_v10 = vrot.slane %v3198_v20, 1 }
 0x558   : > { %v3200_v16 = vadd.f32 %v3199_v10, %v3198_v20 }
 0x55a   : > { %3641 = vpush %v3200_v16 }
 0x58b   : > { %s3642_s15 = spop %3641 }
 0x58c   : > { %s5312_s15 = smov (!%p3173_p0, %s3642_s15), 1.0 }
 0x58d   : > { %v3203_v22 = vstv %s5312_s15 }
 0x58e   : > { %3868 = vrcp.f32 %v3203_v22  ;;  %v3215_v32 = vand.u32 2147483648, %v3203_v22  ;;  %v3213_v3 = vand.u32 2147483647, %v3203_v22  ;;  %vm3209_vm2 = vweird.f32 %v3203_v22 }
 0x590   : > { %v3216_v5 = vor.u32 1.1754944e-38, %v3215_v32  ;;  %vm3214_vm4 = vcmp.eq.f32.partialorder %v3213_v3, 8.507059e+37 }
 0x594   : > { %v3869_v6 = vpop.eup %3868 }
 0x595   : > { %v3205_v41 = vmul.f32 %v3869_v6, %v3203_v22  ;;  %vm3210_vm1 = vweird.f32 %v3869_v6 }
 0x596   : > { %vm3211_vm3 = vmor %vm3209_vm2, %vm3210_vm1 }
 0x597   : > { %v3206_v19 = vsub.f32 1.0, %v3205_v41 }
 0x599   : > { %v3207_v1 = vmul.f32 %v3869_v6, %v3206_v19 }
 0x59b   : > { %v3208_v18 = vadd.f32 %v3869_v6, %v3207_v1 }
 0x59d   : > { %v3212_v30 = vsel %vm3211_vm3, %v3869_v6, %v3208_v18 }
 0x59e   : > { %v3217_v43 = vsel %vm3214_vm4, %v3216_v5, %v3212_v30 }
 0x59f   : > { %3643 = vpush %v3217_v43 }
 0x5d0   : > { %s3644_s16 = spop %3643 }
 0x5d1   : > { %s3219_s17 = smul.f32 %s4214_s6, %s3644_s16 }
 0x5d3   : > { %s5314_s17 = smov (!%p3173_p0, %s3219_s17), 0.0 }
 0x5d4   : > { %v3221_v34 = vstv %s5314_s17 }
 0x5d5   : > { %v3222_v46 = vmul.f32 %v4246_v55, %v3221_v34  ;;  %v3223_v0 = vmul.f32 %v4242_v54, %v3221_v34  ;;  %v3224_v39 = vmul.f32 %v4238_v53, %v3221_v34  ;;  %v3225_v27 = vmul.f32 %v4234_v52, %v3221_v34 }
 0x5d6   : > { %v3230_v12 = vmul.f32 %v4230_v51, %v3221_v34  ;;  %v3231_v25 = vmul.f32 %v4226_v50, %v3221_v34  ;;  %v3232_v31 = vmul.f32 %v4222_v49, %v3221_v34  ;;  %v3233_v36 = vmul.f32 %v4218_v48, %v3221_v34 }
 0x5d7   : > { %v5019_v63 = vadd.f32 %v4310_v63, %v3222_v46   ;;  %v5022_v62 = vadd.f32 %v4306_v62, %v3223_v0   ;;  %v5025_v61 = vadd.f32 %v4302_v61, %v3224_v39   ;;  %v5028_v60 = vadd.f32 %v4298_v60, %v3225_v27  }
 0x5d8   : > { %v5031_v59 = vadd.f32 %v4294_v59, %v3230_v12   ;;  %v5034_v58 = vadd.f32 %v4290_v58, %v3231_v25   ;;  %v5037_v57 = vadd.f32 %v4286_v57, %v3232_v31   ;;  %v5040_v56 = vadd.f32 %v4282_v56, %v3233_v36  }
 0x5d9   : > { %v5286_v9 = vmov %v5019_v63  ;;  %v5287_v33 = vmov %v5022_v62  ;;  %v5288_v29 = vmov %v5025_v61  ;;  %v5289_v4 = vmov %v5028_v60 }
 0x5da   : > { %v5290_v47 = vmov %v5031_v59  ;;  %v5291_v24 = vmov %v5034_v58  ;;  %v5292_v26 = vmov %v5037_v57  ;;  %v5293_v7 = vmov %v5040_v56  ;;  %v5294_v56 = vld [vmem:[#allocation40_spill] sm:$0xff]  ;;  %3319 = vst.msk [vmem:[#allocation14] sm:$0xff] (%p5119_p1), %vm160_vm0, %v5286_v9 }
 0x5db   : > { %v3238_v62 = vmul.f32 %v3221_v34, %v4924_v40  ;;  %v3239_v63 = vmul.f32 %v3221_v34, %v4928_v8  ;;  %v3240_v61 = vmul.f32 %v3221_v34, %v4973_v45  ;;  %v3241_v60 = vmul.f32 %v3221_v34, %v4992_v37  ;;  %v5295_v8 = vld [vmem:[#allocation39_spill] sm:$0xff]  ;;  %v5296_v40 = vld [vmem:[#allocation38_spill] sm:$0xff]  ;;  %3320 = vst.msk [vmem:[#allocation14 + $0x8] sm:$0xff] (%p5119_p1), %vm160_vm0, %v5287_v33 }
 0x5dc   : > { %v3246_v21 = vmul.f32 %v3221_v34, %v4930_v11  ;;  %v3247_v59 = vmul.f32 %v3221_v34, %v4937_v35  ;;  %v3248_v58 = vmul.f32 %v3221_v34, %v4975_v28  ;;  %v3249_v17 = vmul.f32 %v3221_v34, %v4994_v23  ;;  %v5297_v11 = vld [vmem:[#allocation37_spill] sm:$0xff]  ;;  %v5298_v35 = vld [vmem:[#allocation36_spill] sm:$0xff]  ;;  %v5299_v45 = vld [vmem:[#allocation35_spill] sm:$0xff]  ;;  %3321 = vst.msk [vmem:[#allocation14 + $0x10] sm:$0xff] (%p5119_p1), %vm160_vm0, %v5288_v29 }
 0x5dd   : > { %v5051_v14 = vsub.f32 %v4278_v14, %v3238_v62   ;;  %v5054_v15 = vsub.f32 %v4274_v15, %v3239_v63   ;;  %v5057_v16 = vsub.f32 %v5294_v56, %v3240_v61   ;;  %v5060_v57 = vsub.f32 %v5295_v8, %v3241_v60   ;;  %3322 = vst.msk [vmem:[#allocation14 + $0x18] sm:$0xff] (%p5119_p1), %vm160_vm0, %v5289_v4 }
 0x5de   : > { %v5063_v19 = vsub.f32 %v5296_v40, %v3246_v21   ;;  %v5066_v20 = vsub.f32 %v5297_v11, %v3247_v59   ;;  %v5069_v21 = vsub.f32 %v5298_v35, %v3248_v58   ;;  %v5072_v25 = vsub.f32 %v5299_v45, %v3249_v17   ;;  %3323 = vst.msk [vmem:[#allocation15] sm:$0xff] (%p5119_p1), %vm160_vm0, %v5290_v47  ;;  %3339 = dma.vmem_to_hbm [thread:$0]  (%p5119_p1), %s3332_s25, 512, %s3334_s1, [#allocation5], %s4317_s13, %s4317_s13, %s4318_s14  }
 0x5df   : > { %v3254_v28 = vmul.f32 %v5051_v14, %v5051_v14  ;;  %v3255_v37 = vmul.f32 %v5054_v15, %v5054_v15  ;;  %v3256_v23 = vmul.f32 %v5057_v16, %v5057_v16  ;;  %v3257_v42 = vmul.f32 %v5060_v57, %v5060_v57  ;;  %3324 = vst.msk [vmem:[#allocation15 + $0x8] sm:$0xff] (%p5119_p1), %vm160_vm0, %v5291_v24 }
 0x5e0   : > { %v3258_v13 = vmul.f32 %v5063_v19, %v5063_v19  ;;  %v3259_v38 = vmul.f32 %v5066_v20, %v5066_v20  ;;  %v3260_v44 = vmul.f32 %v5069_v21, %v5069_v21  ;;  %v3261_v2 = vmul.f32 %v5072_v25, %v5072_v25  ;;  %3325 = vst.msk [vmem:[#allocation15 + $0x10] sm:$0xff] (%p5119_p1), %vm160_vm0, %v5292_v26 }
 0x5e1   : > { %v3283_v34 = vstv %s3282_s18  ;;  %3326 = vst.msk [vmem:[#allocation15 + $0x18] sm:$0xff] (%p5119_p1), %vm160_vm0, %v5293_v7 }
 0x5e2   : > { %v3262_v10 = vadd.f32 %v3258_v13, %v3254_v28  ;;  %v3263_v22 = vadd.f32 %v3259_v38, %v3255_v37  ;;  %v3264_v6 = vadd.f32 %v3260_v44, %v3256_v23  ;;  %v3265_v41 = vadd.f32 %v3261_v2, %v3257_v42  ;;  %3352 = dma.vmem_to_hbm [thread:$0]  (%p5119_p1), %s3345_s26, 512, %s3347_s28, [#allocation16], %s4317_s13, %s4317_s13, %s4318_s14  }
 0x5e3   : > { %3870 = vrcp.f32 %v3283_v34  ;;  %vm3289_vm5 = vweird.f32 %v3283_v34  ;;  %v3295_v62 = vand.u32 2147483648, %v3283_v34  ;;  %v3293_v61 = vand.u32 2147483647, %v3283_v34 }
 0x5e4   : > { %v3266_v32 = vsel %vm160_vm0, %v3262_v10, 0.0  ;;  %v3267_v1 = vsel %vm160_vm0, %v3263_v22, 0.0  ;;  %v3269_v18 = vsel %vm160_vm0, %v3264_v6, 0.0  ;;  %v3271_v30 = vsel %vm160_vm0, %v3265_v41, 0.0 }
 0x5e5   : > { %v3268_v3 = vadd.f32 %v3267_v1, %v3266_v32  ;;  %v3296_v58 = vor.u32 1.1754944e-38, %v3295_v62  ;;  %vm3294_vm8 = vcmp.eq.f32.partialorder %v3293_v61, 8.507059e+37  ;;  %v5308_v61 = vmov %v5288_v29 }
 0x5e6   : > { %v5309_v62 = vmov %v5287_v33 }
 0x5e7   : > { %v3270_v5 = vadd.f32 %v3269_v18, %v3268_v3 }
 0x5e9   : > { %v3272_v43 = vadd.f32 %v3271_v30, %v3270_v5  ;;  %v3871_v46 = vpop.eup %3870 }
 0x5ea   : > { %v3285_v0 = vmul.f32 %v3871_v46, %v3283_v34  ;;  %vm3290_vm6 = vweird.f32 %v3871_v46 }
 0x5eb   : > { %3273 = vadd.xlane.f32.xlu0 %v3272_v43  ;;  %vm3291_vm7 = vmor %vm3289_vm5, %vm3290_vm6 }
 0x5ec   : > { %v3286_v39 = vsub.f32 1.0, %v3285_v0 }
 0x5ee   : > { %v3287_v12 = vmul.f32 %v3871_v46, %v3286_v39 }
 0x5f0   : > { %v3288_v63 = vadd.f32 %v3871_v46, %v3287_v12 }
 0x5f2   : > { %v3292_v17 = vsel %vm3291_vm7, %v3871_v46, %v3288_v63  ;;  %v5310_v63 = vmov %v5286_v9 }
 0x5f3   : > { %v3297_v40 = vsel %vm3294_vm8, %v3296_v58, %v3292_v17  ;;  %v5302_v17 = vmov %v5060_v57  ;;  %v5305_v58 = vmov %v5291_v24 }
 0x65e   : > { %v3274_v27 = vpop.xlane.xlu0 %3273 }
 0x65f   : > { %v3275_v31 = vrot.slane %v3274_v27, 4 }
 0x661   : > { %v3276_v36 = vadd.f32 %v3275_v31, %v3274_v27 }
 0x663   : > { %v3277_v60 = vrot.slane %v3276_v36, 2 }
 0x665   : > { %v3278_v59 = vadd.f32 %v3277_v60, %v3276_v36  ;;  %v5307_v60 = vmov %v5289_v4 }
 0x667   : > { %v3279_v56 = vrot.slane %v3278_v59, 1 }
 0x669   : > { %v3280_v8 = vadd.f32 %v3279_v56, %v3278_v59  ;;  %v5303_v56 = vmov %v5293_v7  ;;  %v5306_v59 = vmov %v5290_v47 }
 0x66b   : > { %3645 = vpush %v3280_v8 }
 0x66c   : > { %3647 = vpush %v3297_v40 }
 0x69c   : > { %s3646_s2 = spop %3645 }
 0x69d   : > { %s3318_s4 = scalar_select %p3173_p0, %s3646_s2, %s4214_s6  }
 0x69e   : > { %s3648_s19 = spop %3647 }
 0x69f   : > { %s3299_s20 = smul.f32 %s3648_s19, %s3646_s2  ;;  %s5301_s6 = smov %s3318_s4 }
 0x6a1   : > { %s5316_s20 = smov (!%p3173_p0, %s3299_s20), 0.0 }
 0x6a2   : > { %v3301_v11 = vstv %s5316_s20 }
 0x6a3   : > { %v3302_v35 = vmul.f32 %v4246_v55, %v3301_v11  ;;  %v3303_v45 = vmul.f32 %v4242_v54, %v3301_v11  ;;  %v3304_v28 = vmul.f32 %v4238_v53, %v3301_v11  ;;  %v3305_v37 = vmul.f32 %v4234_v52, %v3301_v11  ;;  %181 = sbr.rel (!%p5119_p1) target bundleno = 222 (0xde), region = 87 }
 0x6a4   : > { %v3310_v23 = vmul.f32 %v4230_v51, %v3301_v11  ;;  %v3311_v42 = vmul.f32 %v4226_v50, %v3301_v11  ;;  %v3312_v13 = vmul.f32 %v4222_v49, %v3301_v11  ;;  %v3313_v38 = vmul.f32 %v4218_v48, %v3301_v11 }
 0x6a5   : > { %v3306_v55 = vadd.f32 %v3302_v35, %v5051_v14   ;;  %v3307_v54 = vadd.f32 %v3303_v45, %v5054_v15   ;;  %v3308_v53 = vadd.f32 %v3304_v28, %v5057_v16   ;;  %v3309_v52 = vadd.f32 %v3305_v37, %v5060_v57  }
 0x6a6   : > { %v3314_v51 = vadd.f32 %v3310_v23, %v5063_v19   ;;  %v3315_v50 = vadd.f32 %v3311_v42, %v5066_v20   ;;  %v3316_v49 = vadd.f32 %v3312_v13, %v5069_v21   ;;  %v3317_v48 = vadd.f32 %v3313_v38, %v5072_v25  }
 0x6a7   : > { %v5304_v57 = vmov %v5292_v26 }
 0x6a8   :  { %4208 = dma.done.wait [#allocation5], 512  }
 0x6a9   :  { %4209 = vsyncadd [#allocation5], 4294966784 }
 0x6aa   :  { %4210 = dma.done.wait [#allocation16], 512  }
 0x6ab   :  { %4211 = vsyncadd [#allocation16], 4294966784 }
 0x6ac   :  { %3361 = vsyncpa [#allocation4], 1 }
 0x6ad   :  { %3362 = vsyncpa [#allocation7], 1 }
 0x6ae   :  { %3363 = vsyncpa [#allocation10], 1 }
 0x6af   :  { %3364 = vsyncpa [#allocation13], 1 }
 0x6b0   :  { %3365 = vsyncpa [#allocation5], 1 }
 0x6b1   :  { %3366 = vsyncpa [#allocation16], 1 }

</bundles_post_ra>
